<compile_context>
chip_gen: v7x
topology: tpu7x:2x2x1
jax: 0.10.0
libtpu: 0.0.40
codegen_flags: <defaults>
</compile_context>

<pallas_src>
import functools
import math

import jax
import jax.numpy as jnp
from jax.experimental import pallas as pl
from jax.experimental.pallas import tpu as pltpu


# --------------------------------------------------------------------------- #
# Generation-aware scoped-VMEM limit: ~half of physical VMEM, clamped to
# [32 MiB, 64 MiB]  (v7x: 64 MiB physical -> 32 MiB;  v5e/v6e: 128 -> 64 MiB).
# --------------------------------------------------------------------------- #
def _vmem_limit_bytes():
    cap = 128 * 1024 * 1024
    try:
        info = pltpu.get_tpu_info()
        cap = int(getattr(info, "vmem_capacity_bytes", cap))
    except Exception:
        pass
    return int(min(max(cap // 2, 32 * 1024 * 1024), 64 * 1024 * 1024))


_VMEM_LIMIT = _vmem_limit_bytes()


def _itemsize(dt):
    return jnp.dtype(dt).itemsize


def _seq_tile(s, max_tile=128):
    """Sequence tile that exactly divides s (multiple of 8), else the full length."""
    if s <= max_tile:
        return s
    for t in (256, 128, 64, 32, 16, 8):
        if t <= max_tile and s % t == 0:
            return t
    return s  # TODO(synk): masked partial q/kv tiles for awkward sequence lengths.


def _pick_k_tile(k, max_tk=1024):
    """Reduction tile that divides K exactly (never pad the contraction axis)."""
    if k <= max_tk:
        return k
    for t in range(max_tk, 7, -8):          # multiples of 8, descending
        if k % t == 0:
            return t
    return k  # TODO(synk): masked K remainder for pathological (non-8-divisible) K.


def _m_tile(m, max_tm):
    # max_tm is a multiple of 8; m <= max_tm means a full (legal) block.
    return m if m <= max_tm else max_tm


def _n_tile(n, max_tn=512):
    # max_tn is a multiple of 128; n <= 1024 means a full (legal) lane block.
    return n if n <= 1024 else max_tn


# --------------------------------------------------------------------------- #
# Fused RMSNorm + matmul (used for the concatenated QKV projection)
# --------------------------------------------------------------------------- #
def _norm_matmul_kernel(x_ref, nw_ref, w_ref, o_ref, *, eps):
    # rsqrt goes to the EUP and the per-row scale is VPU filler under the MXU.
    # K (= model dim) is untiled, so the row mean is exact per grid step.
    x = x_ref[...].astype(jnp.float32)
    inv = jax.lax.rsqrt(jnp.mean(x * x, axis=-1, keepdims=True) + eps)
    xn = x * inv
    if x_ref.dtype != jnp.float32:
        xn = xn.astype(x_ref.dtype)                       # .type_as(x)
    xn = nw_ref[...] * xn                                 # RMSNorm weight
    o_ref[...] = jnp.dot(xn, w_ref[...],
                         preferred_element_type=jnp.float32).astype(o_ref.dtype)


def norm_matmul(x, norm_w, w, *, eps):
    """(norm_w * RMSNorm(x)) @ w with the norm fused into the matmul prologue."""
    M, K = x.shape
    K2, N = w.shape
    assert K == K2
    out_dtype = jnp.promote_types(jnp.promote_types(x.dtype, norm_w.dtype), w.dtype)
    tm = _m_tile(M, 256)         # K is untiled -> keep the A tile modest
    tn = _n_tile(N, 512)
    grid = (pl.cdiv(M, tm), pl.cdiv(N, tn))
    cost = pl.CostEstimate(
        flops=2 * M * N * K + 5 * M * K,
        transcendentals=M,
        bytes_accessed=M * K * _itemsize(x.dtype) + K * N * _itemsize(w.dtype)
        + M * N * _itemsize(out_dtype) + K * _itemsize(norm_w.dtype))
    return pl.pallas_call(
        functools.partial(_norm_matmul_kernel, eps=eps),
        out_shape=jax.ShapeDtypeStruct((M, N), out_dtype),
        grid_spec=pltpu.PrefetchScalarGridSpec(
            num_scalar_prefetch=0, grid=grid,
            in_specs=[pl.BlockSpec((tm, K), lambda i, j: (i, 0)),
                      pl.BlockSpec((1, K), lambda i, j: (0, 0)),
                      pl.BlockSpec((K, tn), lambda i, j: (0, j))],
            out_specs=pl.BlockSpec((tm, tn), lambda i, j: (i, j))),
        compiler_params=pltpu.CompilerParams(
            dimension_semantics=("parallel", "parallel"),
            vmem_limit_bytes=_VMEM_LIMIT),
        cost_estimate=cost,
    )(x, norm_w.reshape(1, K), w)


# --------------------------------------------------------------------------- #
# Fused RMSNorm + w1 + w3 + SwiGLU gate
# --------------------------------------------------------------------------- #
def _norm_swiglu_kernel(h_ref, nw_ref, w1_ref, w3_ref, o_ref, *, eps):
    x = h_ref[...].astype(jnp.float32)
    inv = jax.lax.rsqrt(jnp.mean(x * x, axis=-1, keepdims=True) + eps)
    xn = x * inv
    if h_ref.dtype != jnp.float32:
        xn = xn.astype(h_ref.dtype)
    xn = nw_ref[...] * xn
    a = jnp.dot(xn, w1_ref[...], preferred_element_type=jnp.float32)
    b = jnp.dot(xn, w3_ref[...], preferred_element_type=jnp.float32)
    g = a * (1.0 / (1.0 + jnp.exp(-a))) * b               # silu(a) * b
    o_ref[...] = g.astype(o_ref.dtype)


def norm_swiglu(h, norm_w, w1, w3, *, eps):
    """silu(RMSNorm(h) @ w1) * (RMSNorm(h) @ w3), fully fused in one pass."""
    M, K = h.shape
    K2, N = w1.shape
    assert K == K2 and w3.shape == (K, N)
    out_dtype = jnp.promote_types(jnp.promote_types(h.dtype, norm_w.dtype), w1.dtype)
    tm = _m_tile(M, 256)
    tn = _n_tile(N, 512)
    grid = (pl.cdiv(M, tm), pl.cdiv(N, tn))
    cost = pl.CostEstimate(
        flops=4 * M * N * K + 4 * M * N + 5 * M * K,
        transcendentals=M * N + M,
        bytes_accessed=M * K * _itemsize(h.dtype) + 2 * K * N * _itemsize(w1.dtype)
        + M * N * _itemsize(out_dtype) + K * _itemsize(norm_w.dtype))
    return pl.pallas_call(
        functools.partial(_norm_swiglu_kernel, eps=eps),
        out_shape=jax.ShapeDtypeStruct((M, N), out_dtype),
        grid_spec=pltpu.PrefetchScalarGridSpec(
            num_scalar_prefetch=0, grid=grid,
            in_specs=[pl.BlockSpec((tm, K), lambda i, j: (i, 0)),
                      pl.BlockSpec((1, K), lambda i, j: (0, 0)),
                      pl.BlockSpec((K, tn), lambda i, j: (0, j)),
                      pl.BlockSpec((K, tn), lambda i, j: (0, j))],
            out_specs=pl.BlockSpec((tm, tn), lambda i, j: (i, j))),
        compiler_params=pltpu.CompilerParams(
            dimension_semantics=("parallel", "parallel"),
            vmem_limit_bytes=_VMEM_LIMIT),
        cost_estimate=cost,
    )(h, norm_w.reshape(1, K), w1, w3)


# --------------------------------------------------------------------------- #
# K-tiled matmul with the residual add fused into the last-k epilogue
# --------------------------------------------------------------------------- #
def _matmul_res_kernel(a_ref, b_ref, r_ref, o_ref, acc_ref):
    @pl.when(pl.program_id(2) == 0)
    def _():
        acc_ref[...] = jnp.zeros(acc_ref.shape, dtype=jnp.float32)

    acc_ref[...] += jnp.dot(a_ref[...], b_ref[...],
                            preferred_element_type=jnp.float32)

    @pl.when(pl.program_id(2) == pl.num_programs(2) - 1)
    def _():
        # residual add is free VPU filler while the output tile sits in VMEM.
        o_ref[...] = (r_ref[...].astype(jnp.float32) + acc_ref[...]).astype(o_ref.dtype)


def matmul_residual(a, w, res):
    """res + a @ w   (residual fused into the matmul epilogue)."""
    M, K = a.shape
    K2, N = w.shape
    assert K == K2 and res.shape == (M, N)
    out_dtype = jnp.promote_types(jnp.promote_types(a.dtype, w.dtype), res.dtype)
    tm = _m_tile(M, 512)
    tn = _n_tile(N, 512)
    tk = _pick_k_tile(K)
    grid = (pl.cdiv(M, tm), pl.cdiv(N, tn), pl.cdiv(K, tk))
    cost = pl.CostEstimate(
        flops=2 * M * N * K + M * N,
        transcendentals=0,
        bytes_accessed=M * K * _itemsize(a.dtype) + K * N * _itemsize(w.dtype)
        + M * N * (_itemsize(res.dtype) + _itemsize(out_dtype)))
    return pl.pallas_call(
        _matmul_res_kernel,
        out_shape=jax.ShapeDtypeStruct((M, N), out_dtype),
        grid_spec=pltpu.PrefetchScalarGridSpec(
            num_scalar_prefetch=0, grid=grid,
            in_specs=[pl.BlockSpec((tm, tk), lambda i, j, k: (i, k)),
                      pl.BlockSpec((tk, tn), lambda i, j, k: (k, j)),
                      pl.BlockSpec((tm, tn), lambda i, j, k: (i, j))],
            out_specs=pl.BlockSpec((tm, tn), lambda i, j, k: (i, j)),
            scratch_shapes=[pltpu.VMEM((tm, tn), jnp.float32)]),
        compiler_params=pltpu.CompilerParams(
            dimension_semantics=("parallel", "parallel", "arbitrary"),
            vmem_limit_bytes=_VMEM_LIMIT),
        cost_estimate=cost,
    )(a, w, res)


# --------------------------------------------------------------------------- #
# Flash-style attention (online softmax, kv-tiled, GQA via index_map)
# --------------------------------------------------------------------------- #
def _flash_kernel(q_ref, k_ref, v_ref, o_ref, m_ref, l_ref, acc_ref, *, scale):
    ki = pl.program_id(3)

    @pl.when(ki == 0)
    def _():
        m_ref[...] = jnp.full(m_ref.shape, -jnp.inf, dtype=jnp.float32)
        l_ref[...] = jnp.zeros(l_ref.shape, dtype=jnp.float32)
        acc_ref[...] = jnp.zeros(acc_ref.shape, dtype=jnp.float32)

    q = q_ref[...].astype(jnp.float32) * scale            # pre-scale q, not the SxS scores
    k = k_ref[...].astype(jnp.float32)
    s = jax.lax.dot_general(q, k, (((1,), (1,)), ((), ())),
                            preferred_element_type=jnp.float32)    # (tq, tkv)

    # NOTE: the reference PyTorch module applies no causal mask; we match it.
    m_prev = m_ref[...]
    m_new = jnp.maximum(m_prev, jnp.max(s, axis=-1, keepdims=True))
    alpha = jnp.exp(m_prev - m_new)
    p = jnp.exp(s - m_new)                                 # unnormalized probs
    l_ref[...] = alpha * l_ref[...] + jnp.sum(p, axis=-1, keepdims=True)
    acc_ref[...] = alpha * acc_ref[...] + jnp.dot(
        p.astype(v_ref.dtype), v_ref[...], preferred_element_type=jnp.float32)
    m_ref[...] = m_new

    @pl.when(ki == pl.num_programs(3) - 1)
    def _():
        # normalize once at the end: EUP reciprocal instead of S^2 VALU divides.
        o_ref[...] = (acc_ref[...] * pl.reciprocal(l_ref[...], approx=True)
                      ).astype(o_ref.dtype)


def flash_attention(q3, k3, v3, *, n_heads, n_kv_heads, head_dim, scale):
    """softmax(q k^T * scale) v per head.

    q3: (B, S, n_heads*head_dim);  k3/v3: (B, S, n_kv_heads*head_dim).
    Returns (B, S, n_heads*head_dim).  GQA is handled entirely in the K/V
    index_map (kv head = h // n_rep); repeat_kv is never materialized.
    """
    B, S, _ = q3.shape
    n_rep = n_heads // n_kv_heads
    tq = _seq_tile(S)
    tkv = _seq_tile(S)
    grid = (B, n_heads, S // tq, S // tkv)

    cost = pl.CostEstimate(
        flops=4 * B * n_heads * S * S * head_dim,
        transcendentals=B * n_heads * S * S,
        bytes_accessed=(2 * q3.size + k3.size + v3.size) * _itemsize(q3.dtype))

    scratch = [pltpu.VMEM((tq, 1), jnp.float32),
               pltpu.VMEM((tq, 1), jnp.float32),
               pltpu.VMEM((tq, head_dim), jnp.float32)]
    kernel = functools.partial(_flash_kernel, scale=scale)
    cparams = pltpu.CompilerParams(
        dimension_semantics=("parallel", "parallel", "parallel", "arbitrary"),
        vmem_limit_bytes=_VMEM_LIMIT)

    lane_aligned = (head_dim % 128 == 0) or (n_heads == 1)
    if lane_aligned:
        # Fast path: index heads through the lane dim of the (B, S, H*hd)
        # layout produced by the QKV matmul -> zero transposes / copies.
        q_spec = pl.BlockSpec((None, tq, head_dim), lambda b, h, qi, ki: (b, qi, h))
        kv_spec = pl.BlockSpec((None, tkv, head_dim),
                               lambda b, h, qi, ki: (b, ki, h // n_rep))
        return pl.pallas_call(
            kernel,
            out_shape=jax.ShapeDtypeStruct((B, S, n_heads * head_dim), q3.dtype),
            grid_spec=pltpu.PrefetchScalarGridSpec(
                num_scalar_prefetch=0, grid=grid,
                in_specs=[q_spec, kv_spec, kv_spec],
                out_specs=pl.BlockSpec((None, tq, head_dim),
                                       lambda b, h, qi, ki: (b, qi, h)),
                scratch_shapes=scratch),
            compiler_params=cparams, cost_estimate=cost,
        )(q3, k3, v3)

    # Fallback for head_dim not a multiple of 128: (B, H, S, hd) layout.
    # TODO(synk): these transposes materialize HBM copies; only used for
    # unaligned head dims (demo/small models).
    qt = q3.reshape(B, S, n_heads, head_dim).transpose(0, 2, 1, 3)
    kt = k3.reshape(B, S, n_kv_heads, head_dim).transpose(0, 2, 1, 3)
    vt = v3.reshape(B, S, n_kv_heads, head_dim).transpose(0, 2, 1, 3)
    q_spec = pl.BlockSpec((None, None, tq, head_dim),
                          lambda b, h, qi, ki: (b, h, qi, 0))
    kv_spec = pl.BlockSpec((None, None, tkv, head_dim),
                           lambda b, h, qi, ki: (b, h // n_rep, ki, 0))
    ot = pl.pallas_call(
        kernel,
        out_shape=jax.ShapeDtypeStruct((B, n_heads, S, head_dim), q3.dtype),
        grid_spec=pltpu.PrefetchScalarGridSpec(
            num_scalar_prefetch=0, grid=grid,
            in_specs=[q_spec, kv_spec, kv_spec],
            out_specs=pl.BlockSpec((None, None, tq, head_dim),
                                   lambda b, h, qi, ki: (b, h, qi, 0)),
            scratch_shapes=scratch),
        compiler_params=cparams, cost_estimate=cost,
    )(qt, kt, vt)
    return ot.transpose(0, 2, 1, 3).reshape(B, S, n_heads * head_dim)


# ----------------------------- jnp glue (RoPE) --------------------------------
def precompute_rope(head_dim, seq_len, base=10000.0):
    inv_freq = 1.0 / (base ** (jnp.arange(0, head_dim, 2, dtype=jnp.float32) / head_dim))
    t = jnp.arange(seq_len, dtype=jnp.float32)
    freqs = jnp.outer(t, inv_freq)                  # (S, head_dim/2)
    return jnp.cos(freqs), jnp.sin(freqs)           # real/imag of m_theta_complex


def apply_rotary(x, cos, sin):
    # TODO(synk): fuse RoPE into the attention prologue with a lane-dense
    # rotation instead of this interleaved-pair jnp glue.
    B, S, H, hd = x.shape
    xf = x.astype(jnp.float32).reshape(B, S, H, hd // 2, 2)
    xr, xi = xf[..., 0], xf[..., 1]
    c = cos.reshape(1, S, 1, hd // 2)
    s = sin.reshape(1, S, 1, hd // 2)
    out_r = xr * c - xi * s
    out_i = xr * s + xi * c
    out = jnp.stack([out_r, out_i], axis=-1).reshape(B, S, H, hd)
    return out.astype(x.dtype)


def repeat_kv(x, n_rep):
    # Only used by the pure-jnp reference; the Pallas path does GQA in index_map.
    if n_rep == 1:
        return x
    B, S, KH, hd = x.shape
    return jnp.broadcast_to(x[:, :, :, None, :],
                            (B, S, KH, n_rep, hd)).reshape(B, S, KH * n_rep, hd)


# ----------------------------- EncoderBlock forward --------------------------
def encoder_block(x, params, rope_cos, rope_sin, *, n_heads, n_kv_heads,
                  eps=1e-6, start_pos=0):
    """Pallas-backed EncoderBlock.forward (SelfAttention 'train' path)."""
    # TODO(synk): inference-mode KV cache (stateful torch buffer update) is not
    # implemented; this is the mode='train' branch of SelfAttention.forward.
    del start_pos
    B, S, dim = x.shape
    head_dim = dim // n_heads
    nq = n_heads * head_dim
    nkv = n_kv_heads * head_dim

    x2d = x.reshape(B * S, dim)

    # ---- attention branch: fused RMSNorm + concatenated QKV projection ----
    wqkv = jnp.concatenate([params["wq"], params["wk"], params["wv"]], axis=1)
    qkv = norm_matmul(x2d, params["attn_norm_w"], wqkv, eps=eps)

    xq = qkv[:, :nq].reshape(B, S, n_heads, head_dim)
    xk = qkv[:, nq:nq + nkv].reshape(B, S, n_kv_heads, head_dim)
    xv = qkv[:, nq + nkv:].reshape(B, S, nkv)

    xq = apply_rotary(xq, rope_cos, rope_sin).reshape(B, S, nq)
    xk = apply_rotary(xk, rope_cos, rope_sin).reshape(B, S, nkv)

    o = flash_attention(xq, xk, xv, n_heads=n_heads, n_kv_heads=n_kv_heads,
                        head_dim=head_dim, scale=1.0 / math.sqrt(head_dim))

    # h = x + o @ wo   (residual fused into the matmul epilogue)
    h2d = matmul_residual(o.reshape(B * S, dim), params["wo"], x2d)

    # ---- feed-forward branch: fused RMSNorm + w1 + w3 + SwiGLU gate ----
    g = norm_swiglu(h2d, params["ffn_norm_w"], params["w1"], params["w3"], eps=eps)
    # out = h + g @ w2   (residual fused)
    out2d = matmul_residual(g, params["w2"], h2d)
    return out2d.reshape(B, S, dim)


# ----------------------------- pure-jnp reference ----------------------------
def encoder_block_ref(x, params, rope_cos, rope_sin, *, n_heads, n_kv_heads, eps=1e-6):
    hp = jax.lax.Precision.HIGHEST

    def rms(t, w):
        tf = t.astype(jnp.float32)
        inv = jax.lax.rsqrt(jnp.mean(tf * tf, axis=-1, keepdims=True) + eps)
        return w * (tf * inv).astype(t.dtype)

    def lin(t, w):
        return jnp.dot(t, w, precision=hp)

    B, S, dim = x.shape
    head_dim = dim // n_heads
    n_rep = n_heads // n_kv_heads
    xn = rms(x, params["attn_norm_w"])
    xq = lin(xn, params["wq"]).reshape(B, S, n_heads, head_dim)
    xk = lin(xn, params["wk"]).reshape(B, S, n_kv_heads, head_dim)
    xv = lin(xn, params["wv"]).reshape(B, S, n_kv_heads, head_dim)
    xq = apply_rotary(xq, rope_cos, rope_sin)
    xk = apply_rotary(xk, rope_cos, rope_sin)
    q = xq.transpose(0, 2, 1, 3)
    k = repeat_kv(xk, n_rep).transpose(0, 2, 1, 3)
    v = repeat_kv(xv, n_rep).transpose(0, 2, 1, 3)
    s = jnp.einsum("bhqd,bhkd->bhqk", q, k, precision=hp) / math.sqrt(head_dim)
    p = jax.nn.softmax(s.astype(jnp.float32), axis=-1).astype(q.dtype)
    o = jnp.einsum("bhqk,bhkd->bhqd", p, v, precision=hp)
    o = o.transpose(0, 2, 1, 3).reshape(B, S, dim)
    h = x + lin(o, params["wo"])
    hn = rms(h, params["ffn_norm_w"])
    a = lin(hn, params["w1"])
    b = lin(hn, params["w3"])
    g = a * jax.nn.sigmoid(a) * b
    return h + lin(g, params["w2"])


# ----------------------------- params / demo ---------------------------------
def ffn_hidden_dim(dim, multiple_of=32, ffn_dim_multiplier=None):
    hidden = 4 * dim
    hidden = int(2 * hidden / 3)
    if ffn_dim_multiplier:
        hidden = int(ffn_dim_multiplier * hidden)
    return multiple_of * ((hidden + multiple_of - 1) // multiple_of)


def init_params(key, dim, n_heads, n_kv_heads, hidden_dim, dtype=jnp.float32):
    head_dim = dim // n_heads
    ks = jax.random.split(key, 7)

    def w(k, shape):  # stored as (in_features, out_features) == nn.Linear weight.T
        return (0.02 * jax.random.normal(k, shape, dtype=jnp.float32)).astype(dtype)

    return {
        "attn_norm_w": jnp.ones((dim,), dtype),
        "ffn_norm_w": jnp.ones((dim,), dtype),
        "wq": w(ks[0], (dim, n_heads * head_dim)),
        "wk": w(ks[1], (dim, n_kv_heads * head_dim)),
        "wv": w(ks[2], (dim, n_kv_heads * head_dim)),
        "wo": w(ks[3], (n_heads * head_dim, dim)),
        "w1": w(ks[4], (dim, hidden_dim)),
        "w2": w(ks[5], (hidden_dim, dim)),
        "w3": w(ks[6], (dim, hidden_dim)),
    }


if __name__ == "__main__":
    key = jax.random.PRNGKey(0)
    eps = 1e-6
    configs = [
        # (batch, seq, dim, n_heads, n_kv_heads)
        (2, 256, 256, 2, 1),   # head_dim=128: lane-aligned no-transpose flash path, GQA n_rep=2
        (2, 8, 32, 4, 2),      # head_dim=8: small fallback-layout path
    ]
    for idx, (batch, seq, dim, n_heads, n_kv_heads) in enumerate(configs):
        head_dim = dim // n_heads
        hidden_dim = ffn_hidden_dim(dim, multiple_of=32)

        kx, kp, key = jax.random.split(key, 3)
        x = jax.random.normal(kx, (batch, seq, dim), dtype=jnp.float32)
        params = init_params(kp, dim, n_heads, n_kv_heads, hidden_dim)
        rope_cos, rope_sin = precompute_rope(head_dim, seq)

        out = encoder_block(x, params, rope_cos, rope_sin,
                            n_heads=n_heads, n_kv_heads=n_kv_heads, eps=eps,
                            start_pos=0)
        out = jax.block_until_ready(out)

        ref = encoder_block_ref(x, params, rope_cos, rope_sin,
                                n_heads=n_heads, n_kv_heads=n_kv_heads, eps=eps)
        assert out.shape == x.shape, (out.shape, x.shape)
        max_err = float(jnp.max(jnp.abs(out - ref)))
        assert jnp.allclose(out, ref, atol=1e-3, rtol=1e-3), (idx, max_err)

    print("KERNEL_OK")
</pallas_src>

<mosaic_0001>
module attributes {stable_mosaic.version = 11 : i64} {
  func.func @_norm_matmul_kernel(%arg0: i32, %arg1: i32, %arg2: memref<256x256xf32, #tpu.memory_space<vmem>>, %arg3: memref<1x256xf32, #tpu.memory_space<vmem>>, %arg4: memref<256x512xf32, #tpu.memory_space<vmem>>, %arg5: memref<256x512xf32, #tpu.memory_space<vmem>>) attributes {dimension_semantics = [#tpu.dimension_semantics<parallel>, #tpu.dimension_semantics<parallel>], iteration_bounds = array<i64: 2, 1>, scalar_prefetch = 0 : i64, scratch_operands = 0 : i64, tpu.core_type = #tpu.core_type<tc>, window_params = [{transform_indices = @transform_0, window_bounds = array<i64: 256, 256>}, {pipeline_mode = #tpu.pipeline_mode<synchronous>, transform_indices = @transform_1, window_bounds = array<i64: 1, 256>}, {transform_indices = @transform_2, window_bounds = array<i64: 256, 512>}, {transform_indices = @transform_3, window_bounds = array<i64: 256, 512>}]} {
    %c0 = arith.constant 0 : index
    %c0_0 = arith.constant 0 : index
    %0 = vector.load %arg2[%c0, %c0_0] : memref<256x256xf32, #tpu.memory_space<vmem>>, vector<256x256xf32>
    %1 = arith.mulf %0, %0 : vector<256x256xf32>
    %cst = arith.constant dense<0.000000e+00> : vector<256xf32>
    %2 = vector.multi_reduction <add>, %1, %cst [1] : vector<256x256xf32> to vector<256xf32>
    %3 = vector.shape_cast %2 : vector<256xf32> to vector<256x1xf32>
    %cst_1 = arith.constant 2.560000e+02 : f32
    %4 = vector.broadcast %cst_1 : f32 to vector<256x1xf32>
    %5 = arith.divf %3, %4 : vector<256x1xf32>
    %cst_2 = arith.constant 9.99999997E-7 : f32
    %6 = vector.broadcast %cst_2 : f32 to vector<256x1xf32>
    %7 = arith.addf %5, %6 : vector<256x1xf32>
    %8 = math.rsqrt %7 : vector<256x1xf32>
    %9 = vector.broadcast %8 : vector<256x1xf32> to vector<256x256xf32>
    %10 = arith.mulf %0, %9 : vector<256x256xf32>
    %c0_3 = arith.constant 0 : index
    %c0_4 = arith.constant 0 : index
    %11 = vector.load %arg3[%c0_3, %c0_4] : memref<1x256xf32, #tpu.memory_space<vmem>>, vector<1x256xf32>
    %12 = vector.broadcast %11 : vector<1x256xf32> to vector<256x256xf32>
    %13 = arith.mulf %12, %10 : vector<256x256xf32>
    %c0_5 = arith.constant 0 : index
    %c0_6 = arith.constant 0 : index
    %14 = vector.load %arg4[%c0_5, %c0_6] : memref<256x512xf32, #tpu.memory_space<vmem>>, vector<256x512xf32>
    %cst_7 = arith.constant dense<0.000000e+00> : vector<256x512xf32>
    %15 = tpu.matmul %13, %14, %cst_7 {dimension_numbers = #tpu.dot_dimension_numbers<[1], [0], [0], [1], [0, 0, 1, 1], [], []>} : vector<256x256xf32>, vector<256x512xf32>, vector<256x512xf32> -> vector<256x512xf32>
    %c0_8 = arith.constant 0 : index
    %c0_9 = arith.constant 0 : index
    %16 = vector.load %arg5[%c0_8, %c0_9] : memref<256x512xf32, #tpu.memory_space<vmem>>, vector<256x512xf32>
    tpu.vector_store %arg5[%c0_8, %c0_9], %15 {strides = array<i32>} : memref<256x512xf32, #tpu.memory_space<vmem>>, vector<256x512xf32>,
    return
  }
  func.func @transform_0(%arg0: i32, %arg1: i32) -> (i32, i32) {
    %c0_i32 = arith.constant 0 : i32
    %c0_i32_0 = arith.constant 0 : i32
    return %arg0, %c0_i32 : i32, i32
  }
  func.func @transform_1(%arg0: i32, %arg1: i32) -> (i32, i32) {
    %c0_i32 = arith.constant 0 : i32
    %c0_i32_0 = arith.constant 0 : i32
    %c0_i32_1 = arith.constant 0 : i32
    return %c0_i32, %c0_i32_0 : i32, i32
  }
  func.func @transform_2(%arg0: i32, %arg1: i32) -> (i32, i32) {
    %c0_i32 = arith.constant 0 : i32
    %c0_i32_0 = arith.constant 0 : i32
    return %c0_i32, %arg1 : i32, i32
  }
  func.func @transform_3(%arg0: i32, %arg1: i32) -> (i32, i32) {
    %c0_i32 = arith.constant 0 : i32
    return %arg0, %arg1 : i32, i32
  }
}

</mosaic_0001>

<bundles_post_ra>
// kernel: tpu_custom_call.1
= control target key start
LH: loop header
LB: loop body
LE: loop exit
PB: predicated region body
PF: predicated region fallthrough
CT: control target
= control target key end

     0   :  { %8 = vsyncpa [#allocation3], 0  ;;  %s2781_s0 = inlined_call_operand.hbm [shape: f32[512,256], index: 0, kind: input, shape index: {}]   ;;  %s2782_s1 = inlined_call_operand.hbm [shape: f32[1,256], index: 1, kind: input, shape index: {}]   ;;  %s2783_s2 = inlined_call_operand.hbm [shape: f32[256,512], index: 2, kind: input, shape index: {}]   ;;  %s2784_s3 = inlined_call_operand.hbm [shape: f32[512,512], index: 3, kind: output, shape index: {}]  }
   0x1   :  { %10 = vsyncpa [#allocation3 + $0x1], 0 }
   0x2   :  { %11 = vsyncpa [#allocation6], 0 }
   0x3   :  { %12 = vsyncpa [#allocation4], 0 }
   0x4   :  { %14 = vsyncpa [#allocation4 + $0x1], 0  ;;  %s2161_s12 = smov 0   ;;  %s2163_s13 = smov 0  }
   0x5   :  { %s2165_s14 = smov 0   ;;  %s2167_s15 = smov 0  }
   0x6   :  { %s2169_s16 = smov 0   ;;  %s2171_s17 = smov 0  }
   0x7 LB: > { %s1596_s18 = sadd.s32 4294967295, %s2129_s17   ;;  %s1597_s19 = sadd.s32 4294967294, %s2129_s17   ;;  %s2129_s17 = sphi %s2171_s17, %s20_s17   ;;  %s2125_s16 = sphi %s2169_s16, %s2811_s16   ;;  %s2121_s15 = sphi %s2167_s15, %s2810_s15   ;;  %s2117_s14 = sphi %s2165_s14, %s2809_s14   ;;  %s2113_s13 = sphi %s2163_s13, %s2808_s13   ;;  %s2109_s12 = sphi %s2161_s12, %s2807_s12  }
   0x8   : > { %s39_s20 = sadd.s32 1, %s2117_s14  ;;  %p46_p0 = scmp.ne.s32.totalorder %s2117_s14, %s2113_s13 }
   0x9   : > { %p47_p1 = scmp.eq.s32.totalorder %s2129_s17, 0  ;;  %p52_p2 = scmp.ne.s32.totalorder %s2113_s13, %s2109_s12 }
   0xa   : > { %p2199_p3 = scmp.eq.s32.totalorder %s1596_s18, 0  ;;  %p125_p4 = scmp.eq.s32.totalorder %s1596_s18, 1 }
   0xb   : > { %p2203_p5 = por %p47_p1, %p46_p0  ;;  %p131_p6 = scmp.eq.s32.totalorder %s1597_s19, 1 }
   0xc   : > { %s2791_s21 = scalar_select %p2199_p3, 1, 0 }
   0xd   : > { %p2209_p7 = por %p2199_p3, %p52_p2  ;;  %p2213_p8 = por %p125_p4, %p46_p0 }
   0xe   : > { %p2217_p9 = por %p131_p6, %p52_p2  ;;  %p1598_p10 = scmp.ge.s32.totalorder %s2129_s17, 1 }
   0xf   : > { %s2793_s23 = scalar_select %p2209_p7, 1, 0 }
  0x10   : > { %s2794_s24 = scalar_select %p2213_p8, 1, 0 }
  0x11   : > { %s2795_s25 = scalar_select %p2217_p9, 1, 0 }
  0x12   : > { %p138_p11 = scmp.lt.s32.totalorder %s2129_s17, 3  ;;  %s2131_s27 = smov [#allocation5]  }
  0x13   : > { %s151_s28 = sshll.u32 %s2131_s27, 4  ;;  %p1778_p1 = scmp.lt.s32.totalorder %s2129_s17, 2  ;;  %s152_s28 = int_to_ptr.vmem [resolvable:$true] %s151_s28 }
  0x14   : > { %p2224_p13 = pnand %p1598_p10, %p138_p11  ;;  %s2132_s30 = smov [#allocation7]  }
  0x15   : > { %p2233_p4 = pnand %p1778_p1, %p2203_p5  ;;  %s164_s4 = sshll.u32 %s2132_s30, 4  ;;  %s2243_s4 = int_to_ptr.vmem [resolvable:$true] %s164_s4 }
  0x16   : > { %s2796_s26 = scalar_select %p2224_p13, 1, 0 }
  0x17   : > { %p1761_p0 = pneg %p2224_p13  ;;  %s1957_s8 = scalar_lea.hbm %s2782_s1, 32 }
  0x18   : > { %s2797_s29 = scalar_select %p2233_p4, 1, 0 }
  0x19   : > { %p2239_p2 = pnand %p1761_p0, %p2199_p3  ;;  %p1958_p5 = scmp.ne.s32.totalorder %s2782_s1, %s1957_s8 }
  0x1a   : > { %p1964_p1 = scmp.lt.u32.totalorder %s1957_s8, %s2782_s1 }
  0x1b   : > { %p1959_p6 = pneg %p2239_p2 }
  0x1d   : > { %p1960_p10 = pnand %p1959_p6, %p1958_p5 }
  0x1f   : > { %p1961_p11 = pneg %p1960_p10 }
  0x21   : > { %p1966_p0 = pnand %p1964_p1, %p1961_p11 }
  0x23   : > { %1969 = shalt.err (!%p1966_p0)
}
  0x24   : > { %s1970_s19 = scalar_lea.vmem %s152_s28, 32  ;;  %p1978_p3 = scmp.lt.s32.totalorder %s152_s28, %s152_s28 }
  0x25   : > { %p1971_p12 = scmp.ne.s32.totalorder %s152_s28, %s1970_s19  ;;  %p1979_p7 = scmp.lt.s32.totalorder %s1970_s19, %s1970_s19 }
  0x27   : > { %p1973_p9 = pnand %p1971_p12, %p1959_p6  ;;  %p1980_p13 = por %p1979_p7, %p1978_p3 }
  0x29   : > { %p1974_p8 = pneg %p1973_p9 }
  0x2b   : > { %p1981_p4 = pnand %p1980_p13, %p1974_p8 }
  0x2d   : > { %1984 = shalt.err (!%p1981_p4)
}
  0x2e   : > { %1764 = dma.hbm_to_vmem [thread:$0]  (!%p2239_p2), %s2782_s1, 32, %s152_s28, [#allocation6]  }
  0x2f   : > { %s1985_s7 = scalar_lea.hbm %s2783_s2, 16384 }
  0x30   : > { %p1986_p9 = scmp.ne.s32.totalorder %s2783_s2, %s1985_s7  ;;  %p1992_p8 = scmp.lt.u32.totalorder %s1985_s7, %s2783_s2 }
  0x32   : > { %p1988_p3 = pnand %p1986_p9, %p1959_p6 }
  0x34   : > { %p1989_p7 = pneg %p1988_p3 }
  0x36   : > { %p1994_p12 = pnand %p1992_p8, %p1989_p7 }
  0x38   : > { %1997 = shalt.err (!%p1994_p12)
}
  0x39   : > { %s1998_s28 = scalar_lea.vmem %s2243_s4, 16384  ;;  %p2006_p10 = scmp.lt.s32.totalorder %s2243_s4, %s2243_s4 }
  0x3a   : > { %p1999_p13 = scmp.ne.s32.totalorder %s2243_s4, %s1998_s28  ;;  %p2007_p11 = scmp.lt.s32.totalorder %s1998_s28, %s1998_s28 }
  0x3c   : > { %p2001_p4 = pnand %p1999_p13, %p1959_p6  ;;  %p2008_p1 = por %p2007_p11, %p2006_p10 }
  0x3e   : > { %p2002_p5 = pneg %p2001_p4 }
  0x40   : > { %p2009_p0 = pnand %p2008_p1, %p2002_p5 }
  0x42   : > { %2012 = shalt.err (!%p2009_p0)
}
  0x43   : > { %s2133_s18 = smov 512   ;;  %s2134_s19 = smov 32  }
  0x44   : > { %1767 = dma.hbm_to_vmem [thread:$0]  (!%p2239_p2), %s2783_s2, 16384, %s2243_s4, [#allocation6], %s2133_s18, %s2133_s18, %s2134_s19  }
  0x45   : > { %s178_s30 = sand.u32 1, %s2117_s14   ;;  %s32_s6 = sadd.s32 1, %s2125_s16 }
  0x46   : > { %s1602_s7 = sshll.u32 %s178_s30, 9  ;;  %p34_p6 = scmp.ge.s32.totalorder %s32_s6, 2 }
  0x47   : > { %s1618_s8 = sshll.u32 %s2125_s16, 13  ;;  %s182_s9 = scalar_lea.vmem [#allocation2], %s1602_s7 }
  0x48   : > { %s190_s10 = sshll.u32 %s182_s9, 4  ;;  %s2813_s6 = smov (%p34_p6, %s32_s6), 0  ;;  %s2302_s10 = int_to_ptr.vmem [resolvable:$true] %s190_s10 }
  0x49   : > { %s2300_s5 = scalar_lea.hbm %s2781_s0, %s1618_s8  ;;  %s36_s4 = ssub.s32 %s2125_s16, %s2813_s6 }
  0x4a   : > { %p2306_p2 = scmp.eq.s32.totalorder %s36_s4, 0  ;;  %s2310_s19 = scalar_lea.sflag [#allocation3], %s178_s30 }
  0x4b   : > { %s2013_s22 = scalar_lea.hbm %s2300_s5, 8192  ;;  %p2800_p3 = scmp.ne.s32.totalorder %s2797_s29, 0 }
  0x4c   : > { %p2014_p9 = scmp.ne.s32.totalorder %s2300_s5, %s2013_s22  ;;  %s2018_s8 = scalar_lea.hbm %s2781_s0, 16384 }
  0x4d   : > { %p2015_p7 = pneg %p2800_p3  ;;  %p2019_p13 = scmp.lt.u32.totalorder %s2300_s5, %s2781_s0 }
  0x4e   : > { %p2020_p4 = scmp.lt.u32.totalorder %s2018_s8, %s2013_s22  ;;  %p2022_p10 = scmp.lt.u32.totalorder %s2013_s22, %s2300_s5 }
  0x4f   : > { %p2016_p8 = pnand %p2015_p7, %p2014_p9 }
  0x50   : > { %p2021_p5 = por %p2020_p4, %p2019_p13 }
  0x51   : > { %p2017_p12 = pneg %p2016_p8 }
  0x52   : > { %p2023_p11 = por %p2022_p10, %p2021_p5 }
  0x54   : > { %p2024_p1 = pnand %p2023_p11, %p2017_p12 }
  0x56   : > { %2027 = shalt.err (!%p2024_p1)
}
  0x57   : > { %s2028_s30 = scalar_lea.vmem %s2302_s10, 8192  ;;  %s2135_s28 = smov [#allocation2]  }
  0x58   : > { %p2029_p0 = scmp.ne.s32.totalorder %s2302_s10, %s2028_s30  ;;  %s2033_s4 = sshll.u32 %s2135_s28, 4  ;;  %s2034_s4 = int_to_ptr.vmem [resolvable:$false] %s2033_s4 }
  0x59   : > { %s2035_s27 = scalar_lea.vmem %s2034_s4, 16384  ;;  %p2036_p8 = scmp.lt.s32.totalorder %s2302_s10, %s2034_s4 }
  0x5a   : > { %p2031_p6 = pnand %p2029_p0, %p2015_p7  ;;  %p2037_p13 = scmp.lt.s32.totalorder %s2035_s27, %s2028_s30 }
  0x5c   : > { %p2032_p9 = pneg %p2031_p6  ;;  %p2038_p4 = por %p2037_p13, %p2036_p8 }
  0x5e   : > { %p2039_p5 = pnand %p2038_p4, %p2032_p9 }
  0x60   : > { %2042 = shalt.err (!%p2039_p5)
}
  0x61   : > { %s2136_s22 = smov 256   ;;  %s2137_s7 = smov 16  }
  0x62   : > { %1771 = dma.hbm_to_vmem [thread:$0]  (!%p2800_p3), %s2300_s5, 8192, %s2302_s10, %s2310_s19, %s2136_s22, %s2136_s22, %s2137_s7  }
  0x63   : > { %s2343_s8 = scalar_select %p2306_p2, %s2117_s14, %s39_s20  }
  0x64   : > { %p2801_p7 = scmp.ne.s32.totalorder %s2796_s26, 0 }
  0x65   : > { %s2348_s9 = sand.u32 (!%p2801_p7), 1, %s2113_s13   ;;  %p2802_p12 = scmp.ne.s32.totalorder (!%p2801_p7), %s2793_s23, 0 }
  0x66   : > { %202 = sbr.rel (%p2801_p7) target bundleno = 632 (0x278), region = 32  ;;  %s1607_s11 = sshll.u32 (!%p2801_p7), %s2348_s9, 9 }
  0x67   : > { %s205_s30 = scalar_lea.sflag (!%p2801_p7), [#allocation3], %s2348_s9  ;;  %s2352_s28 = scalar_lea.vmem (!%p2801_p7), [#allocation2], %s1607_s11 }
  0x6d   : > { %2096 = dma.done.wait (%p2802_p12), %s205_s30, 8192  }
  0x6e   : > { %2098 = vsyncadd (%p2802_p12), %s205_s30, 4294959104  ;;  %p2803_p2 = scmp.ne.s32.totalorder %s2791_s21, 0 }
  0x70   : > { %2100 = dma.done.wait (%p2803_p2), [#allocation6], 16416  }
  0x71   : > { %2102 = vsyncadd (%p2803_p2), [#allocation6], 4294950880  ;;  %v2363_v0 = vld [vmem:[%s2352_s28] sm:$0xff]  ;;  %v2366_v1 = vld [vmem:[%s2352_s28 + $0x8] sm:$0xff]  ;;  %s1610_s20 = sshll.u32 %s2348_s9, 10  ;;  %s1620_s23 = sshll.u32 %s2121_s15, 14 }
  0x72   : > { %v2369_v2 = vld [vmem:[%s2352_s28 + $0x10] sm:$0xff]  ;;  %v307_v3 = vmul.f32 %v2363_v0, %v2363_v0  ;;  %v308_v4 = vmul.f32 %v2366_v1, %v2366_v1  ;;  %v2376_v5 = vld [vmem:[%s2352_s28 + $0x18] sm:$0xff]  ;;  %v2381_v7 = vld [vmem:[%s2352_s28 + $0x20] sm:$0xff]  ;;  %s2595_s21 = scalar_lea.vmem [#allocation8], %s1610_s20  ;;  %s2726_s5 = scalar_lea.hbm %s2784_s3, %s1620_s23 }
  0x73   : > { %v309_v6 = vmul.f32 %v2369_v2, %v2369_v2  ;;  %v2384_v8 = vld [vmem:[%s2352_s28 + $0x28] sm:$0xff]  ;;  %v310_v9 = vmul.f32 %v2376_v5, %v2376_v5  ;;  %v311_v10 = vmul.f32 %v2381_v7, %v2381_v7  ;;  %v2393_v12 = vld [vmem:[%s2352_s28 + $0x30] sm:$0xff]  ;;  %v2396_v13 = vld [vmem:[%s2352_s28 + $0x38] sm:$0xff]  ;;  %s1491_s26 = sshll.u32 %s2595_s21, 4  ;;  %s1475_s15 = scalar_lea.sflag [#allocation4], %s2348_s9  ;;  %s2728_s26 = int_to_ptr.vmem [resolvable:$true] %s1491_s26 }
  0x74   : > { %v312_v11 = vmul.f32 %v2384_v8, %v2384_v8  ;;  %v251_v14 = vld [vmem:[%s2352_s28 + $0x40] sm:$0xff]  ;;  %v371_v15 = vadd.f32 %v308_v4, %v307_v3  ;;  %v313_v16 = vmul.f32 %v2393_v12, %v2393_v12  ;;  %v314_v17 = vmul.f32 %v2396_v13, %v2396_v13  ;;  %v2404_v18 = vld [vmem:[%s2352_s28 + $0x48] sm:$0xff]  ;;  %v253_v19 = vld [vmem:[%s2352_s28 + $0x50] sm:$0xff]  ;;  %s2043_s18 = scalar_lea.vmem %s2728_s26, 16384  ;;  %p2804_p10 = scmp.ne.s32.totalorder %s2794_s24, 0 }
  0x75   : > { %v254_v20 = vld [vmem:[%s2352_s28 + $0x58] sm:$0xff]  ;;  %v374_v22 = vadd.f32 %v310_v9, %v309_v6  ;;  %v315_v23 = vmul.f32 %v251_v14, %v251_v14  ;;  %v316_v24 = vmul.f32 %v2404_v18, %v2404_v18  ;;  %v317_v26 = vmul.f32 %v253_v19, %v253_v19  ;;  %v255_v28 = vld [vmem:[%s2352_s28 + $0x60] sm:$0xff]  ;;  %v256_v29 = vld [vmem:[%s2352_s28 + $0x68] sm:$0xff]  ;;  %p2044_p3 = scmp.ne.s32.totalorder %s2728_s26, %s2043_s18  ;;  %s2138_s19 = smov [#allocation8]  }
  0x76   : > { %v377_v21 = vadd.f32 %v312_v11, %v311_v10  ;;  %372 = vadd.xlane.f32.xlu0 %v371_v15  ;;  %v380_v25 = vadd.f32 %v314_v17, %v313_v16  ;;  %v318_v27 = vmul.f32 %v254_v20, %v254_v20  ;;  %v257_v30 = vld [vmem:[%s2352_s28 + $0x70] sm:$0xff]  ;;  %v258_v31 = vld [vmem:[%s2352_s28 + $0x78] sm:$0xff]  ;;  %v319_v33 = vmul.f32 %v255_v28, %v255_v28  ;;  %v259_v38 = vld [vmem:[%s2352_s28 + $0x80] sm:$0xff]  ;;  %s2047_s4 = sshll.u32 %s2138_s19, 4  ;;  %s2048_s4 = int_to_ptr.vmem [resolvable:$false] %s2047_s4 }
  0x77   : > { %v383_v32 = vadd.f32 %v316_v24, %v315_v23  ;;  %v320_v34 = vmul.f32 %v256_v29, %v256_v29  ;;  %v321_v36 = vmul.f32 %v257_v30, %v257_v30  ;;  %v322_v37 = vmul.f32 %v258_v31, %v258_v31  ;;  %v260_v39 = vld [vmem:[%s2352_s28 + $0x88] sm:$0xff]  ;;  %v261_v40 = vld [vmem:[%s2352_s28 + $0x90] sm:$0xff]  ;;  %v262_v41 = vld [vmem:[%s2352_s28 + $0x98] sm:$0xff]  ;;  %p2045_p11 = pnand %p2044_p3, %p2804_p10  ;;  %s2049_s27 = scalar_lea.vmem %s2048_s4, 32768 }
  0x78   : > { %378 = vadd.xlane.f32.xlu1 %v377_v21  ;;  %v386_v35 = vadd.f32 %v318_v27, %v317_v26  ;;  %v323_v43 = vmul.f32 %v259_v38, %v259_v38  ;;  %v324_v44 = vmul.f32 %v260_v39, %v260_v39  ;;  %v263_v45 = vld [vmem:[%s2352_s28 + $0xa0] sm:$0xff]  ;;  %v264_v46 = vld [vmem:[%s2352_s28 + $0xa8] sm:$0xff]  ;;  %v325_v48 = vmul.f32 %v261_v40, %v261_v40  ;;  %v265_v50 = vld [vmem:[%s2352_s28 + $0xb0] sm:$0xff]  ;;  %p2050_p0 = scmp.lt.s32.totalorder %s2728_s26, %s2048_s4  ;;  %p2051_p6 = scmp.lt.s32.totalorder %s2049_s27, %s2043_s18 }
  0x79   : > { %v389_v42 = vadd.f32 %v320_v34, %v319_v33  ;;  %v392_v47 = vadd.f32 %v322_v37, %v321_v36  ;;  %v326_v49 = vmul.f32 %v262_v41, %v262_v41  ;;  %v266_v51 = vld [vmem:[%s2352_s28 + $0xb8] sm:$0xff]  ;;  %v267_v52 = vld [vmem:[%s2352_s28 + $0xc0] sm:$0xff]  ;;  %v327_v53 = vmul.f32 %v263_v45, %v263_v45  ;;  %v268_v55 = vld [vmem:[%s2352_s28 + $0xc8] sm:$0xff]  ;;  %p2046_p1 = pneg %p2045_p11 }
  0x7a   : > { %375 = vadd.xlane.f32.xlu0 %v374_v22  ;;  %v328_v54 = vmul.f32 %v264_v46, %v264_v46  ;;  %v269_v56 = vld [vmem:[%s2352_s28 + $0xd0] sm:$0xff]  ;;  %v395_v58 = vadd.f32 %v324_v44, %v323_v43  ;;  %v329_v59 = vmul.f32 %v265_v50, %v265_v50  ;;  %v330_v60 = vmul.f32 %v266_v51, %v266_v51  ;;  %v707_v62 = vld [vmem:[#allocation7 + $0x18] sm:$0xff]  ;;  %v704_v4 = vld [vmem:[#allocation7] sm:$0xff]  ;;  %p2052_p9 = por %p2051_p6, %p2050_p0 }
  0x7b   : > { %v705_v57 = vld [vmem:[#allocation7 + $0x8] sm:$0xff]  ;;  %v711_v63 = vld [vmem:[#allocation7 + $0x38] sm:$0xff]  ;;  %v398_v3 = vadd.f32 %v326_v49, %v325_v48  ;;  %v708_v6 = vld [vmem:[#allocation7 + $0x20] sm:$0xff]  ;;  %v331_v10 = vmul.f32 %v267_v52, %v267_v52  ;;  %v332_v27 = vmul.f32 %v268_v55, %v268_v55  ;;  %v333_v28 = vmul.f32 %v269_v56, %v269_v56 }
  0x7c   : > { %381 = vadd.xlane.f32.xlu1 %v380_v25  ;;  %v709_v61 = vld [vmem:[#allocation7 + $0x28] sm:$0xff]  ;;  %v706_v9 = vld [vmem:[#allocation7 + $0x10] sm:$0xff]  ;;  %v401_v16 = vadd.f32 %v328_v54, %v327_v53  ;;  %v271_v17 = vld [vmem:[%s2352_s28 + $0xe0] sm:$0xff]  ;;  %v1685_v20 = vpack.c.bf16 %v711_v63, %v707_v62  ;;  %v1623_v21 = vpack.c.bf16 %v708_v6, %v704_v4  ;;  %v404_v26 = vadd.f32 %v330_v60, %v329_v59  ;;  %p2053_p8 = pnand %p2052_p9, %p2046_p1 }
  0x7d   : > { %v270_v11 = vld [vmem:[%s2352_s28 + $0xd8] sm:$0xff]  ;;  %v1621_v14 = vpack.c.bf16 %v709_v61, %v705_v57  ;;  %v272_v19 = vld [vmem:[%s2352_s28 + $0xe8] sm:$0xff]  ;;  %v273_v33 = vld [vmem:[%s2352_s28 + $0xf0] sm:$0xff]  ;;  %v407_v49 = vadd.f32 %v332_v27, %v331_v10  ;;  %v335_v50 = vmul.f32 %v271_v17, %v271_v17 }
  0x7e   : > { %384 = vadd.xlane.f32.xlu0 %v383_v32  ;;  %v710_v15 = vld [vmem:[#allocation7 + $0x30] sm:$0xff]  ;;  %v713_v23 = vld [vmem:[#allocation7 + $0x48] sm:$0xff]  ;;  %v715_v25 = vld [vmem:[#allocation7 + $0x58] sm:$0xff]  ;;  %v334_v32 = vmul.f32 %v270_v11, %v270_v11  ;;  %1686 = vmatprep.subr.bf16.mxu1 %v1685_v20  ;;  %v336_v51 = vmul.f32 %v272_v19, %v272_v19  ;;  %v337_v57 = vmul.f32 %v273_v33, %v273_v33 }
  0x7f   : > { %v1687_v22 = vpack.c.bf16 %v710_v15, %v706_v9  ;;  %v717_v24 = vld [vmem:[#allocation7 + $0x68] sm:$0xff]  ;;  %1622 = vmatprep.subr.bf16.mxu0 %v1621_v14  ;;  %v719_v29 = vld [vmem:[#allocation7 + $0x78] sm:$0xff]  ;;  %v712_v30 = vld [vmem:[#allocation7 + $0x40] sm:$0xff] }
  0x80   : > { %387 = vadd.xlane.f32.xlu1 %v386_v35  ;;  %v716_v31 = vld [vmem:[#allocation7 + $0x60] sm:$0xff]  ;;  %v1625_v34 = vpack.c.bf16 %v717_v24, %v713_v23  ;;  %v1689_v35 = vpack.c.bf16 %v719_v29, %v715_v25  ;;  %v714_v36 = vld [vmem:[#allocation7 + $0x50] sm:$0xff]  ;;  %1624 = vmatpush1.bf16.msra.mxu0 %v1623_v21  ;;  %v721_v41 = vld [vmem:[#allocation7 + $0x88] sm:$0xff]  ;;  %v410_v56 = vadd.f32 %v334_v32, %v333_v28 }
  0x81   : > { %v718_v37 = vld [vmem:[#allocation7 + $0x70] sm:$0xff]  ;;  %1688 = vmatpush1.bf16.msra.mxu1 %v1687_v22  ;;  %v1627_v39 = vpack.c.bf16 %v716_v31, %v712_v30  ;;  %v275_v43 = vld [vmem:[%s2352_s28 + $0x100] sm:$0xff]  ;;  %v276_v44 = vld [vmem:[%s2352_s28 + $0x108] sm:$0xff]  ;;  %v413_v17 = vadd.f32 %v336_v51, %v335_v50 }
  0x82   : > { %390 = vadd.xlane.f32.xlu0 %v389_v42  ;;  %v274_v38 = vld [vmem:[%s2352_s28 + $0xf8] sm:$0xff]  ;;  %v1691_v40 = vpack.c.bf16 %v718_v37, %v714_v36  ;;  %v725_v42 = vld [vmem:[#allocation7 + $0xa8] sm:$0xff]  ;;  %1626 = vmatprep.subr.bf16.mxu0 %v1625_v34  ;;  %v720_v48 = vld [vmem:[#allocation7 + $0x80] sm:$0xff]  ;;  %v339_v19 = vmul.f32 %v275_v43, %v275_v43  ;;  %v340_v20 = vmul.f32 %v276_v44, %v276_v44 }
  0x83   : > { %1690 = vmatprep.subr.bf16.mxu1 %v1689_v35  ;;  %v1629_v45 = vpack.c.bf16 %v725_v42, %v721_v41  ;;  %v723_v46 = vld [vmem:[#allocation7 + $0x98] sm:$0xff]  ;;  %v724_v53 = vld [vmem:[#allocation7 + $0xa0] sm:$0xff]  ;;  %v722_v54 = vld [vmem:[#allocation7 + $0x90] sm:$0xff] }
  0x84   : > { %393 = vadd.xlane.f32.xlu1 %v392_v47  ;;  %v727_v47 = vld [vmem:[#allocation7 + $0xb8] sm:$0xff]  ;;  %v726_v55 = vld [vmem:[#allocation7 + $0xb0] sm:$0xff]  ;;  %v729_v61 = vld [vmem:[#allocation7 + $0xc8] sm:$0xff]  ;;  %1628 = vmatpush1.bf16.msra.mxu0 %v1627_v39  ;;  %v1631_v62 = vpack.c.bf16 %v724_v53, %v720_v48  ;;  %v419_v41 = vadd.f32 %v340_v20, %v339_v19 }
  0x85   : > { %v1693_v52 = vpack.c.bf16 %v727_v47, %v723_v46  ;;  %v277_v59 = vld [vmem:[%s2352_s28 + $0x110] sm:$0xff]  ;;  %v278_v60 = vld [vmem:[%s2352_s28 + $0x118] sm:$0xff]  ;;  %1692 = vmatpush1.bf16.msra.mxu1 %v1691_v40  ;;  %v1695_v63 = vpack.c.bf16 %v726_v55, %v722_v54  ;;  %v279_v9 = vld [vmem:[%s2352_s28 + $0x120] sm:$0xff]  ;;  %1630 = vmatprep.subr.bf16.mxu0 %v1629_v45 }
  0x86   : > { %396 = vadd.xlane.f32.xlu0 %v395_v58  ;;  %v338_v58 = vmul.f32 %v274_v38, %v274_v38  ;;  %v731_v4 = vld [vmem:[#allocation7 + $0xd8] sm:$0xff]  ;;  %v728_v14 = vld [vmem:[#allocation7 + $0xc0] sm:$0xff]  ;;  %v281_v22 = vld [vmem:[%s2352_s28 + $0x130] sm:$0xff]  ;;  %v341_v25 = vmul.f32 %v277_v59, %v277_v59  ;;  %v343_v42 = vmul.f32 %v279_v9, %v279_v9 }
  0x87   : > { %v735_v6 = vld [vmem:[#allocation7 + $0xf8] sm:$0xff]  ;;  %1694 = vmatprep.subr.bf16.mxu1 %v1693_v52  ;;  %v732_v15 = vld [vmem:[#allocation7 + $0xe0] sm:$0xff]  ;;  %v734_v23 = vld [vmem:[#allocation7 + $0xf0] sm:$0xff]  ;;  %v345_v48 = vmul.f32 %v281_v22, %v281_v22 }
  0x88   : > { %399 = vadd.xlane.f32.xlu1 %v398_v3  ;;  %v733_v3 = vld [vmem:[#allocation7 + $0xe8] sm:$0xff]  ;;  %v1697_v11 = vpack.c.bf16 %v735_v6, %v731_v4  ;;  %v416_v24 = vadd.f32 %v338_v58, %v337_v57  ;;  %v739_v29 = vld [vmem:[#allocation7 + $0x118] sm:$0xff]  ;;  %1632 = vmatpush1.bf16.msra.mxu0 %v1631_v62  ;;  %v1635_v31 = vpack.c.bf16 %v732_v15, %v728_v14  ;;  %v736_v34 = vld [vmem:[#allocation7 + $0x100] sm:$0xff] }
  0x89   : > { %v1633_v10 = vpack.c.bf16 %v733_v3, %v729_v61  ;;  %v280_v21 = vld [vmem:[%s2352_s28 + $0x128] sm:$0xff]  ;;  %v282_v30 = vld [vmem:[%s2352_s28 + $0x138] sm:$0xff]  ;;  %1696 = vmatpush1.bf16.msra.mxu1 %v1695_v63  ;;  %v283_v35 = vld [vmem:[%s2352_s28 + $0x140] sm:$0xff] }
  0x8a   : > { %402 = vadd.xlane.f32.xlu0 %v401_v16  ;;  %v730_v16 = vld [vmem:[#allocation7 + $0xd0] sm:$0xff]  ;;  %v737_v27 = vld [vmem:[#allocation7 + $0x108] sm:$0xff]  ;;  %v743_v33 = vld [vmem:[#allocation7 + $0x138] sm:$0xff]  ;;  %1698 = vmatprep.subr.bf16.mxu1 %v1697_v11  ;;  %v344_v43 = vmul.f32 %v280_v21, %v280_v21  ;;  %v347_v3 = vmul.f32 %v283_v35, %v283_v35 }
  0x8b   : > { %v741_v28 = vld [vmem:[#allocation7 + $0x128] sm:$0xff]  ;;  %v1699_v32 = vpack.c.bf16 %v734_v23, %v730_v16  ;;  %1634 = vmatprep.subr.bf16.mxu0 %v1633_v10  ;;  %v1701_v37 = vpack.c.bf16 %v743_v33, %v739_v29  ;;  %v740_v38 = vld [vmem:[#allocation7 + $0x120] sm:$0xff]  ;;  %v738_v39 = vld [vmem:[#allocation7 + $0x110] sm:$0xff] }
  0x8c   : > { %405 = vadd.xlane.f32.xlu1 %v404_v26  ;;  %v342_v26 = vmul.f32 %v278_v60, %v278_v60  ;;  %v1637_v36 = vpack.c.bf16 %v741_v28, %v737_v27  ;;  %v742_v40 = vld [vmem:[#allocation7 + $0x130] sm:$0xff]  ;;  %v284_v44 = vld [vmem:[%s2352_s28 + $0x148] sm:$0xff]  ;;  %v747_v51 = vld [vmem:[#allocation7 + $0x158] sm:$0xff]  ;;  %1636 = vmatpush1.bf16.msra.mxu0 %v1635_v31  ;;  %v1639_v54 = vpack.c.bf16 %v740_v38, %v736_v34 }
  0x8d   : > { %v745_v45 = vld [vmem:[#allocation7 + $0x148] sm:$0xff]  ;;  %v751_v52 = vld [vmem:[#allocation7 + $0x178] sm:$0xff]  ;;  %1700 = vmatpush1.bf16.msra.mxu1 %v1699_v32  ;;  %v1703_v55 = vpack.c.bf16 %v742_v40, %v738_v39  ;;  %v748_v57 = vld [vmem:[#allocation7 + $0x160] sm:$0xff]  ;;  %v425_v63 = vadd.f32 %v344_v43, %v343_v42  ;;  %v348_v4 = vmul.f32 %v284_v44, %v284_v44 }
  0x8e   : > { %408 = vadd.xlane.f32.xlu0 %v407_v49  ;;  %v749_v46 = vld [vmem:[#allocation7 + $0x168] sm:$0xff]  ;;  %v422_v47 = vadd.f32 %v342_v26, %v341_v25  ;;  %v346_v49 = vmul.f32 %v282_v30, %v282_v30  ;;  %v286_v53 = vld [vmem:[%s2352_s28 + $0x158] sm:$0xff]  ;;  %1638 = vmatprep.subr.bf16.mxu0 %v1637_v36  ;;  %v1705_v59 = vpack.c.bf16 %v751_v52, %v747_v51  ;;  %v287_v16 = vld [vmem:[%s2352_s28 + $0x160] sm:$0xff] }
  0x8f   : > { %v285_v50 = vld [vmem:[%s2352_s28 + $0x150] sm:$0xff]  ;;  %1702 = vmatprep.subr.bf16.mxu1 %v1701_v37  ;;  %v1641_v58 = vpack.c.bf16 %v749_v46, %v745_v45  ;;  %v755_v9 = vld [vmem:[#allocation7 + $0x198] sm:$0xff]  ;;  %v350_v15 = vmul.f32 %v286_v53, %v286_v53  ;;  %v752_v23 = vld [vmem:[#allocation7 + $0x180] sm:$0xff]  ;;  %v431_v30 = vadd.f32 %v348_v4, %v347_v3  ;;  %v351_v31 = vmul.f32 %v287_v16, %v287_v16 }
  0x90   : > { %411 = vadd.xlane.f32.xlu1 %v410_v56  ;;  %v744_v56 = vld [vmem:[#allocation7 + $0x140] sm:$0xff]  ;;  %v746_v60 = vld [vmem:[#allocation7 + $0x150] sm:$0xff]  ;;  %v753_v62 = vld [vmem:[#allocation7 + $0x188] sm:$0xff]  ;;  %v428_v11 = vadd.f32 %v346_v49, %v345_v48  ;;  %v349_v14 = vmul.f32 %v285_v50, %v285_v50  ;;  %1640 = vmatpush1.bf16.msra.mxu0 %v1639_v54 }
  0x91   : > { %v750_v61 = vld [vmem:[#allocation7 + $0x170] sm:$0xff]  ;;  %v757_v6 = vld [vmem:[#allocation7 + $0x1a8] sm:$0xff]  ;;  %v759_v10 = vld [vmem:[#allocation7 + $0x1b8] sm:$0xff]  ;;  %1704 = vmatpush1.bf16.msra.mxu1 %v1703_v55  ;;  %v1643_v21 = vpack.c.bf16 %v748_v57, %v744_v56  ;;  %1642 = vmatprep.subr.bf16.mxu0 %v1641_v58 }
  0x92   : > { %414 = vadd.xlane.f32.xlu0 %v413_v17  ;;  %v288_v17 = vld [vmem:[%s2352_s28 + $0x168] sm:$0xff]  ;;  %v289_v19 = vld [vmem:[%s2352_s28 + $0x170] sm:$0xff]  ;;  %v290_v20 = vld [vmem:[%s2352_s28 + $0x178] sm:$0xff]  ;;  %v1707_v22 = vpack.c.bf16 %v750_v61, %v746_v60  ;;  %1706 = vmatprep.subr.bf16.mxu1 %v1705_v59  ;;  %v1645_v25 = vpack.c.bf16 %v757_v6, %v753_v62  ;;  %v1709_v26 = vpack.c.bf16 %v759_v10, %v755_v9 }
  0x93   : > { %v754_v27 = vld [vmem:[#allocation7 + $0x190] sm:$0xff]  ;;  %v761_v29 = vld [vmem:[#allocation7 + $0x1c8] sm:$0xff]  ;;  %v352_v32 = vmul.f32 %v288_v17, %v288_v17  ;;  %v763_v34 = vld [vmem:[#allocation7 + $0x1d8] sm:$0xff]  ;;  %v434_v36 = vadd.f32 %v350_v15, %v349_v14  ;;  %v353_v37 = vmul.f32 %v289_v19, %v289_v19  ;;  %v354_v38 = vmul.f32 %v290_v20, %v290_v20 }
  0x94   : > { %417 = vadd.xlane.f32.xlu1 %v416_v24  ;;  %v756_v24 = vld [vmem:[#allocation7 + $0x1a0] sm:$0xff]  ;;  %v758_v28 = vld [vmem:[#allocation7 + $0x1b0] sm:$0xff]  ;;  %v765_v33 = vld [vmem:[#allocation7 + $0x1e8] sm:$0xff]  ;;  %1644 = vmatpush1.bf16.msra.mxu0 %v1643_v21 }
  0x95   : > { %v767_v35 = vld [vmem:[#allocation7 + $0x1f8] sm:$0xff]  ;;  %v292_v40 = vld [vmem:[%s2352_s28 + $0x188] sm:$0xff]  ;;  %1708 = vmatpush1.bf16.msra.mxu1 %v1707_v22  ;;  %v1647_v43 = vpack.c.bf16 %v756_v24, %v752_v23  ;;  %v1711_v44 = vpack.c.bf16 %v758_v28, %v754_v27  ;;  %1646 = vmatprep.subr.bf16.mxu0 %v1645_v25  ;;  %v762_v49 = vld [vmem:[#allocation7 + $0x1d0] sm:$0xff]  ;;  %v437_v52 = vadd.f32 %v352_v32, %v351_v31 }
  0x96   : > { %420 = vadd.xlane.f32.xlu0 %v419_v41  ;;  %v291_v39 = vld [vmem:[%s2352_s28 + $0x180] sm:$0xff]  ;;  %v293_v41 = vld [vmem:[%s2352_s28 + $0x190] sm:$0xff]  ;;  %v294_v42 = vld [vmem:[%s2352_s28 + $0x198] sm:$0xff]  ;;  %1710 = vmatprep.subr.bf16.mxu1 %v1709_v26  ;;  %v1713_v48 = vpack.c.bf16 %v767_v35, %v763_v34  ;;  %v356_v54 = vmul.f32 %v292_v40, %v292_v40  ;;  %v440_v58 = vadd.f32 %v354_v38, %v353_v37 }
  0x97   : > { %v760_v45 = vld [vmem:[#allocation7 + $0x1c0] sm:$0xff]  ;;  %v766_v50 = vld [vmem:[#allocation7 + $0x1f0] sm:$0xff]  ;;  %v769_v51 = vld [vmem:[#allocation7 + $0x208] sm:$0xff]  ;;  %v355_v53 = vmul.f32 %v291_v39, %v291_v39  ;;  %v357_v59 = vmul.f32 %v293_v41, %v293_v41  ;;  %v358_v60 = vmul.f32 %v294_v42, %v294_v42 }
  0x98   : > { %423 = vadd.xlane.f32.xlu1 %v422_v47  ;;  %v764_v46 = vld [vmem:[#allocation7 + $0x1e0] sm:$0xff]  ;;  %v1649_v47 = vpack.c.bf16 %v765_v33, %v761_v29  ;;  %v773_v55 = vld [vmem:[#allocation7 + $0x228] sm:$0xff]  ;;  %v771_v56 = vld [vmem:[#allocation7 + $0x218] sm:$0xff]  ;;  %1648 = vmatpush1.bf16.msra.mxu0 %v1647_v43  ;;  %v1715_v6 = vpack.c.bf16 %v766_v50, %v762_v49 }
  0x99   : > { %v775_v57 = vld [vmem:[#allocation7 + $0x238] sm:$0xff]  ;;  %v296_v62 = vld [vmem:[%s2352_s28 + $0x1a8] sm:$0xff]  ;;  %1712 = vmatpush1.bf16.msra.mxu1 %v1711_v44  ;;  %v1651_v4 = vpack.c.bf16 %v764_v46, %v760_v45  ;;  %v770_v15 = vld [vmem:[#allocation7 + $0x210] sm:$0xff]  ;;  %v443_v19 = vadd.f32 %v356_v54, %v355_v53  ;;  %v446_v25 = vadd.f32 %v358_v60, %v357_v59 }
  0x9a   : > { %426 = vadd.xlane.f32.xlu0 %v425_v63  ;;  %v295_v61 = vld [vmem:[%s2352_s28 + $0x1a0] sm:$0xff]  ;;  %v297_v63 = vld [vmem:[%s2352_s28 + $0x1b0] sm:$0xff]  ;;  %v298_v3 = vld [vmem:[%s2352_s28 + $0x1b8] sm:$0xff]  ;;  %1650 = vmatprep.subr.bf16.mxu0 %v1649_v47  ;;  %v1717_v14 = vpack.c.bf16 %v775_v57, %v771_v56  ;;  %v360_v21 = vmul.f32 %v296_v62, %v296_v62 }
  0x9b   : > { %v768_v9 = vld [vmem:[#allocation7 + $0x200] sm:$0xff]  ;;  %1714 = vmatprep.subr.bf16.mxu1 %v1713_v48  ;;  %v774_v16 = vld [vmem:[#allocation7 + $0x230] sm:$0xff]  ;;  %v777_v17 = vld [vmem:[#allocation7 + $0x248] sm:$0xff]  ;;  %v359_v20 = vmul.f32 %v295_v61, %v295_v61  ;;  %v361_v26 = vmul.f32 %v297_v63, %v297_v63  ;;  %v362_v27 = vmul.f32 %v298_v3, %v298_v3 }
  0x9c   : > { %429 = vadd.xlane.f32.xlu1 %v428_v11  ;;  %v772_v10 = vld [vmem:[#allocation7 + $0x220] sm:$0xff]  ;;  %v1653_v11 = vpack.c.bf16 %v773_v55, %v769_v51  ;;  %v781_v22 = vld [vmem:[#allocation7 + $0x268] sm:$0xff]  ;;  %v779_v23 = vld [vmem:[#allocation7 + $0x258] sm:$0xff]  ;;  %1652 = vmatpush1.bf16.msra.mxu0 %v1651_v4  ;;  %v1719_v33 = vpack.c.bf16 %v774_v16, %v770_v15 }
  0x9d   : > { %v783_v24 = vld [vmem:[#allocation7 + $0x278] sm:$0xff]  ;;  %v300_v29 = vld [vmem:[%s2352_s28 + $0x1c8] sm:$0xff]  ;;  %1716 = vmatpush1.bf16.msra.mxu1 %v1715_v6  ;;  %v1655_v32 = vpack.c.bf16 %v772_v10, %v768_v9  ;;  %v778_v38 = vld [vmem:[#allocation7 + $0x250] sm:$0xff]  ;;  %v449_v41 = vadd.f32 %v360_v21, %v359_v20  ;;  %v452_v47 = vadd.f32 %v362_v27, %v361_v26 }
  0x9e   : > { %432 = vadd.xlane.f32.xlu0 %v431_v30  ;;  %v299_v28 = vld [vmem:[%s2352_s28 + $0x1c0] sm:$0xff]  ;;  %v301_v30 = vld [vmem:[%s2352_s28 + $0x1d0] sm:$0xff]  ;;  %v302_v31 = vld [vmem:[%s2352_s28 + $0x1d8] sm:$0xff]  ;;  %1654 = vmatprep.subr.bf16.mxu0 %v1653_v11  ;;  %v1721_v37 = vpack.c.bf16 %v783_v24, %v779_v23  ;;  %v364_v43 = vmul.f32 %v300_v29, %v300_v29 }
  0x9f   : > { %v776_v34 = vld [vmem:[#allocation7 + $0x240] sm:$0xff]  ;;  %1718 = vmatprep.subr.bf16.mxu1 %v1717_v14  ;;  %v782_v39 = vld [vmem:[#allocation7 + $0x270] sm:$0xff]  ;;  %v785_v40 = vld [vmem:[#allocation7 + $0x288] sm:$0xff]  ;;  %v363_v42 = vmul.f32 %v299_v28, %v299_v28  ;;  %v365_v48 = vmul.f32 %v301_v30, %v301_v30  ;;  %v366_v49 = vmul.f32 %v302_v31, %v302_v31 }
  0xa0   : > { %435 = vadd.xlane.f32.xlu1 %v434_v36  ;;  %v780_v35 = vld [vmem:[#allocation7 + $0x260] sm:$0xff]  ;;  %v1657_v36 = vpack.c.bf16 %v781_v22, %v777_v17  ;;  %v789_v44 = vld [vmem:[#allocation7 + $0x2a8] sm:$0xff]  ;;  %v787_v45 = vld [vmem:[#allocation7 + $0x298] sm:$0xff]  ;;  %1656 = vmatpush1.bf16.msra.mxu0 %v1655_v32  ;;  %v1723_v55 = vpack.c.bf16 %v782_v39, %v778_v38 }
  0xa1   : > { %v791_v46 = vld [vmem:[#allocation7 + $0x2b8] sm:$0xff]  ;;  %v304_v51 = vld [vmem:[%s2352_s28 + $0x1e8] sm:$0xff]  ;;  %1720 = vmatpush1.bf16.msra.mxu1 %v1719_v33  ;;  %v1659_v54 = vpack.c.bf16 %v780_v35, %v776_v34  ;;  %v786_v60 = vld [vmem:[#allocation7 + $0x290] sm:$0xff]  ;;  %v455_v63 = vadd.f32 %v364_v43, %v363_v42  ;;  %v458_v11 = vadd.f32 %v366_v49, %v365_v48 }
  0xa2   : > { %438 = vadd.xlane.f32.xlu0 %v437_v52  ;;  %v303_v50 = vld [vmem:[%s2352_s28 + $0x1e0] sm:$0xff]  ;;  %v305_v52 = vld [vmem:[%s2352_s28 + $0x1f0] sm:$0xff]  ;;  %v306_v53 = vld [vmem:[%s2352_s28 + $0x1f8] sm:$0xff]  ;;  %1658 = vmatprep.subr.bf16.mxu0 %v1657_v36  ;;  %v1725_v59 = vpack.c.bf16 %v791_v46, %v787_v45  ;;  %v368_v4 = vmul.f32 %v304_v51, %v304_v51 }
  0xa3   : > { %v784_v56 = vld [vmem:[#allocation7 + $0x280] sm:$0xff]  ;;  %1722 = vmatprep.subr.bf16.mxu1 %v1721_v37  ;;  %v790_v61 = vld [vmem:[#allocation7 + $0x2b0] sm:$0xff]  ;;  %v793_v62 = vld [vmem:[#allocation7 + $0x2c8] sm:$0xff]  ;;  %v367_v3 = vmul.f32 %v303_v50, %v303_v50  ;;  %v369_v14 = vmul.f32 %v305_v52, %v305_v52  ;;  %v370_v15 = vmul.f32 %v306_v53, %v306_v53 }
  0xa4   : > { %441 = vadd.xlane.f32.xlu1 %v440_v58  ;;  %v788_v57 = vld [vmem:[#allocation7 + $0x2a0] sm:$0xff]  ;;  %v1661_v58 = vpack.c.bf16 %v789_v44, %v785_v40  ;;  %v797_v6 = vld [vmem:[#allocation7 + $0x2e8] sm:$0xff]  ;;  %v795_v9 = vld [vmem:[#allocation7 + $0x2d8] sm:$0xff]  ;;  %1660 = vmatpush1.bf16.msra.mxu0 %v1659_v54  ;;  %v1727_v17 = vpack.c.bf16 %v790_v61, %v786_v60 }
  0xa5   : > { %v799_v10 = vld [vmem:[#allocation7 + $0x2f8] sm:$0xff]  ;;  %1724 = vmatpush1.bf16.msra.mxu1 %v1723_v55  ;;  %v1663_v16 = vpack.c.bf16 %v788_v57, %v784_v56  ;;  %v796_v20 = vld [vmem:[#allocation7 + $0x2e0] sm:$0xff]  ;;  %v1665_v21 = vpack.c.bf16 %v797_v6, %v793_v62  ;;  %v794_v23 = vld [vmem:[#allocation7 + $0x2d0] sm:$0xff]  ;;  %v461_v26 = vadd.f32 %v368_v4, %v367_v3  ;;  %v464_v30 = vadd.f32 %v370_v15, %v369_v14 }
  0xa6   : > { %444 = vadd.xlane.f32.xlu0 %v443_v19  ;;  %v792_v19 = vld [vmem:[#allocation7 + $0x2c0] sm:$0xff]  ;;  %1662 = vmatprep.subr.bf16.mxu0 %v1661_v58  ;;  %v1729_v22 = vpack.c.bf16 %v799_v10, %v795_v9  ;;  %v798_v24 = vld [vmem:[#allocation7 + $0x2f0] sm:$0xff]  ;;  %v805_v27 = vld [vmem:[#allocation7 + $0x328] sm:$0xff] }
  0xa7   : > { %1726 = vmatprep.subr.bf16.mxu1 %v1725_v59  ;;  %v803_v28 = vld [vmem:[#allocation7 + $0x318] sm:$0xff]  ;;  %v1667_v31 = vpack.c.bf16 %v796_v20, %v792_v19  ;;  %v1731_v32 = vpack.c.bf16 %v798_v24, %v794_v23  ;;  %v800_v33 = vld [vmem:[#allocation7 + $0x300] sm:$0xff]  ;;  %v802_v37 = vld [vmem:[#allocation7 + $0x310] sm:$0xff] }
  0xa8   : > { %447 = vadd.xlane.f32.xlu1 %v446_v25  ;;  %v801_v25 = vld [vmem:[#allocation7 + $0x308] sm:$0xff]  ;;  %v807_v29 = vld [vmem:[#allocation7 + $0x338] sm:$0xff]  ;;  %1664 = vmatpush1.bf16.msra.mxu0 %v1663_v16  ;;  %v804_v34 = vld [vmem:[#allocation7 + $0x320] sm:$0xff] }
  0xa9   : > { %1728 = vmatpush1.bf16.msra.mxu1 %v1727_v17  ;;  %1666 = vmatprep.subr.bf16.mxu0 %v1665_v21  ;;  %v1669_v35 = vpack.c.bf16 %v805_v27, %v801_v25  ;;  %v1733_v36 = vpack.c.bf16 %v807_v29, %v803_v28  ;;  %v806_v38 = vld [vmem:[#allocation7 + $0x330] sm:$0xff]  ;;  %v809_v39 = vld [vmem:[#allocation7 + $0x348] sm:$0xff]  ;;  %v815_v42 = vld [vmem:[#allocation7 + $0x378] sm:$0xff]  ;;  %v1671_v43 = vpack.c.bf16 %v804_v34, %v800_v33 }
  0xaa   : > { %450 = vadd.xlane.f32.xlu0 %v449_v41  ;;  %1730 = vmatprep.subr.bf16.mxu1 %v1729_v22  ;;  %v813_v40 = vld [vmem:[#allocation7 + $0x368] sm:$0xff]  ;;  %v811_v41 = vld [vmem:[#allocation7 + $0x358] sm:$0xff]  ;;  %v1735_v44 = vpack.c.bf16 %v806_v38, %v802_v37  ;;  %v808_v45 = vld [vmem:[#allocation7 + $0x340] sm:$0xff] }
  0xab   : > { %v812_v46 = vld [vmem:[#allocation7 + $0x360] sm:$0xff]  ;;  %v1737_v48 = vpack.c.bf16 %v815_v42, %v811_v41  ;;  %v810_v49 = vld [vmem:[#allocation7 + $0x350] sm:$0xff]  ;;  %v817_v51 = vld [vmem:[#allocation7 + $0x388] sm:$0xff] }
  0xac   : > { %453 = vadd.xlane.f32.xlu1 %v452_v47  ;;  %1668 = vmatpush1.bf16.msra.mxu0 %v1667_v31  ;;  %v1673_v47 = vpack.c.bf16 %v813_v40, %v809_v39  ;;  %v814_v50 = vld [vmem:[#allocation7 + $0x370] sm:$0xff]  ;;  %v821_v52 = vld [vmem:[#allocation7 + $0x3a8] sm:$0xff]  ;;  %v819_v53 = vld [vmem:[#allocation7 + $0x398] sm:$0xff]  ;;  %v1675_v55 = vpack.c.bf16 %v812_v46, %v808_v45 }
  0xad   : > { %1732 = vmatpush1.bf16.msra.mxu1 %v1731_v32  ;;  %1670 = vmatprep.subr.bf16.mxu0 %v1669_v35  ;;  %v823_v54 = vld [vmem:[#allocation7 + $0x3b8] sm:$0xff]  ;;  %v1739_v56 = vpack.c.bf16 %v814_v50, %v810_v49  ;;  %v816_v57 = vld [vmem:[#allocation7 + $0x380] sm:$0xff]  ;;  %v1677_v59 = vpack.c.bf16 %v821_v52, %v817_v51  ;;  %v818_v61 = vld [vmem:[#allocation7 + $0x390] sm:$0xff] }
  0xae   : > { %456 = vadd.xlane.f32.xlu0 %v455_v63  ;;  %1734 = vmatprep.subr.bf16.mxu1 %v1733_v36  ;;  %v820_v58 = vld [vmem:[#allocation7 + $0x3a0] sm:$0xff]  ;;  %v1741_v60 = vpack.c.bf16 %v823_v54, %v819_v53  ;;  %v822_v62 = vld [vmem:[#allocation7 + $0x3b0] sm:$0xff]  ;;  %v825_v63 = vld [vmem:[#allocation7 + $0x3c8] sm:$0xff] }
  0xaf   : > { %v829_v3 = vld [vmem:[#allocation7 + $0x3e8] sm:$0xff]  ;;  %v827_v4 = vld [vmem:[#allocation7 + $0x3d8] sm:$0xff]  ;;  %v1679_v9 = vpack.c.bf16 %v820_v58, %v816_v57  ;;  %v1743_v10 = vpack.c.bf16 %v822_v62, %v818_v61  ;;  %v828_v16 = vld [vmem:[#allocation7 + $0x3e0] sm:$0xff] }
  0xb0   : > { %459 = vadd.xlane.f32.xlu1 %v458_v11  ;;  %1672 = vmatpush1.bf16.msra.mxu0 %v1671_v43  ;;  %v831_v6 = vld [vmem:[#allocation7 + $0x3f8] sm:$0xff]  ;;  %v824_v11 = vld [vmem:[#allocation7 + $0x3c0] sm:$0xff]  ;;  %v1681_v14 = vpack.c.bf16 %v829_v3, %v825_v63  ;;  %v826_v17 = vld [vmem:[#allocation7 + $0x3d0] sm:$0xff] }
  0xb1   : > { %1736 = vmatpush1.bf16.msra.mxu1 %v1735_v44  ;;  %1674 = vmatprep.subr.bf16.mxu0 %v1673_v47  ;;  %v1745_v15 = vpack.c.bf16 %v831_v6, %v827_v4  ;;  %v830_v19 = vld [vmem:[#allocation7 + $0x3f0] sm:$0xff]  ;;  %v1683_v20 = vpack.c.bf16 %v828_v16, %v824_v11  ;;  %v628_v43 = vld [vmem:[#allocation5] sm:$0x3] }
  0xb2   : > { %462 = vadd.xlane.f32.xlu0 %v461_v26  ;;  %1738 = vmatprep.subr.bf16.mxu1 %v1737_v48  ;;  %v1747_v21 = vpack.c.bf16 %v830_v19, %v826_v17  ;;  %v630_v26 = vlaneseq }
  0xb4   : > { %465 = vadd.xlane.f32.xlu1 %v464_v30  ;;  %1676 = vmatpush1.bf16.msra.mxu0 %v1675_v55  ;;  %v631_v33 = vshrl.u32 %v630_v26, 7 }
  0xb5   : > { %1740 = vmatpush1.bf16.msra.mxu1 %v1739_v56  ;;  %1678 = vmatprep.subr.bf16.mxu0 %v1677_v59 }
  0xb6   : > { %1742 = vmatprep.subr.bf16.mxu1 %v1741_v60  ;;  %v632_v40 = vsub.s32 0, %v631_v33  ;;  %v636_v41 = vsub.s32 1, %v631_v33  ;;  %v1905_v33 = vld [vmem:[%s2352_s28 + $0x68] sm:$0xff] }
  0xb8   : > { %1680 = vmatpush1.bf16.msra.mxu0 %v1679_v9  ;;  %v2462_v47 = vrot.slane %v628_v43, %v632_v40  ;;  %v2464_v48 = vrot.slane %v628_v43, %v636_v41 }
  0xb9   : > { %1744 = vmatpush1.bf16.msra.mxu1 %v1743_v10  ;;  %1682 = vmatprep.subr.bf16.mxu0 %v1681_v14 }
  0xba   : > { %1746 = vmatprep.subr.bf16.mxu1 %v1745_v15 }
  0xbc   : > { %1684 = vmatpush1.bf16.msra.mxu0 %v1683_v20 }
  0xbd   : > { %1748 = vmatpush1.bf16.msra.mxu1 %v1747_v21  ;;  %v1902_v21 = vld [vmem:[%s2352_s28 + $0x40] sm:$0xff] }
 0x103   : > { %v373_v22 = vpop.xlane.xlu0 %372 }
 0x104   : > { %v468_v23 = vmul.f32 0.00390625, %v373_v22 }
 0x105   : > { %v379_v24 = vpop.xlane.xlu1 %378 }
 0x106   : > { %v470_v25 = vmul.f32 0.00390625, %v379_v24  ;;  %v500_v27 = vadd.f32 1e-06, %v468_v23 }
 0x107   : > { %v376_v28 = vpop.xlane.xlu0 %375 }
 0x108   : > { %v502_v29 = vadd.f32 1e-06, %v470_v25  ;;  %1838 = vrsqrt.f32 %v500_v27  ;;  %v469_v30 = vmul.f32 0.00390625, %v376_v28  ;;  %v1903_v25 = vld [vmem:[%s2352_s28 + $0x58] sm:$0xff] }
 0x109   : > { %v382_v31 = vpop.xlane.xlu1 %381 }
 0x10a   : > { %1840 = vrsqrt.f32 %v502_v29  ;;  %v471_v32 = vmul.f32 0.00390625, %v382_v31  ;;  %v501_v34 = vadd.f32 1e-06, %v469_v30  ;;  %v1904_v30 = vld [vmem:[%s2352_s28 + $0x50] sm:$0xff] }
 0x10b   : > { %v385_v36 = vpop.xlane.xlu0 %384 }
 0x10c   : > { %v503_v35 = vadd.f32 1e-06, %v471_v32  ;;  %1842 = vrsqrt.f32 %v501_v34  ;;  %v472_v37 = vmul.f32 0.00390625, %v385_v36 }
 0x10d   : > { %v388_v38 = vpop.xlane.xlu1 %387 }
 0x10e   : > { %1844 = vrsqrt.f32 %v503_v35  ;;  %v473_v39 = vmul.f32 0.00390625, %v388_v38  ;;  %v504_v42 = vadd.f32 1e-06, %v472_v37 }
 0x10f   : > { %v391_v44 = vpop.xlane.xlu0 %390 }
 0x110   : > { %1846 = vrsqrt.f32 %v504_v42  ;;  %v505_v45 = vadd.f32 1e-06, %v473_v39  ;;  %v474_v46 = vmul.f32 0.00390625, %v391_v44  ;;  %v1906_v39 = vld [vmem:[%s2352_s28 + $0x60] sm:$0xff]  ;;  %v1907_v44 = vld [vmem:[%s2352_s28 + $0x78] sm:$0xff] }
 0x111   : > { %v394_v49 = vpop.xlane.xlu1 %393 }
 0x112   : > { %v1839_v50 = vpop.eup %1838  ;;  %1848 = vrsqrt.f32 %v505_v45  ;;  %v506_v54 = vadd.f32 1e-06, %v474_v46  ;;  %v475_v55 = vmul.f32 0.00390625, %v394_v49 }
 0x113   : > { %v565_v52 = vmul.f32 %v1839_v50, %v2366_v1  ;;  %v564_v53 = vmul.f32 %v1839_v50, %v2363_v0  ;;  %v397_v59 = vpop.xlane.xlu0 %396 }
 0x114   : > { %v1841_v51 = vpop.eup %1840  ;;  %1850 = vrsqrt.f32 %v506_v54  ;;  %v507_v0 = vadd.f32 1e-06, %v475_v55  ;;  %v476_v3 = vmul.f32 0.00390625, %v397_v59  ;;  %v1909_v55 = vld [vmem:[%s2352_s28 + $0x88] sm:$0xff] }
 0x115   : > { %v641_v56 = vmul.f32 %v2464_v48, %v565_v52  ;;  %v640_v57 = vmul.f32 %v2462_v47, %v564_v53  ;;  %v569_v58 = vmul.f32 %v1841_v51, %v2384_v8  ;;  %v568_v63 = vmul.f32 %v1841_v51, %v2381_v7  ;;  %v400_v4 = vpop.xlane.xlu1 %399  ;;  %v1908_v52 = vld [vmem:[%s2352_s28 + $0x70] sm:$0xff] }
 0x116   : > { %v1843_v60 = vpop.eup %1842  ;;  %1852 = vrsqrt.f32 %v507_v0  ;;  %v508_v7 = vadd.f32 1e-06, %v476_v3  ;;  %v1911_v3 = vld [vmem:[%s2352_s28 + $0x98] sm:$0xff] }
 0x117   : > { %896 = vmatprep.mubr.f32.mxu0 %v641_v56  ;;  %1153 = vmatprep.mubr.f32.mxu1 %v641_v56  ;;  %v567_v62 = vmul.f32 %v1843_v60, %v2376_v5  ;;  %v566_v1 = vmul.f32 %v1843_v60, %v2369_v2  ;;  %v645_v9 = vmul.f32 %v2464_v48, %v569_v58  ;;  %v477_v2 = vmul.f32 0.00390625, %v400_v4  ;;  %v403_v16 = vpop.xlane.xlu0 %402 }
 0x118   : > { %v1845_v61 = vpop.eup %1844  ;;  %897 = vmatmul.mubr.f32.vlgmr.msra.gmra.mrb[0].mxu0 %v640_v57  ;;  %1154 = vmatmul.mubr.f32.vlgmr.msra.gmra.mrb[0].mxu1 %v640_v57  ;;  %v644_v5 = vmul.f32 %v2462_v47, %v568_v63  ;;  %1854 = vrsqrt.f32 %v508_v7  ;;  %v478_v23 = vmul.f32 0.00390625, %v403_v16  ;;  %v1913_v7 = vld [vmem:[%s2352_s28 + $0xa8] sm:$0xff] }
 0x119   : > { %v643_v6 = vmul.f32 %v2464_v48, %v567_v62  ;;  %v642_v8 = vmul.f32 %v2462_v47, %v566_v1  ;;  %v571_v10 = vmul.f32 %v1845_v61, %v2396_v13  ;;  %v570_v14 = vmul.f32 %v1845_v61, %v2393_v12  ;;  %v406_v12 = vpop.xlane.xlu1 %405  ;;  %v1910_v61 = vld [vmem:[%s2352_s28 + $0x80] sm:$0xff] }
 0x11a   : > { %v1847_v11 = vpop.eup %1846  ;;  %v509_v19 = vadd.f32 1e-06, %v477_v2  ;;  %v479_v27 = vmul.f32 0.00390625, %v406_v12  ;;  %v510_v29 = vadd.f32 1e-06, %v478_v23  ;;  %v1915_v12 = vld [vmem:[%s2352_s28 + $0xb8] sm:$0xff] }
 0x11b   : > { %902 = vmatprep.mubr.f32.mxu0 %v643_v6  ;;  %1159 = vmatprep.mubr.f32.mxu1 %v643_v6  ;;  %v647_v15 = vmul.f32 %v2464_v48, %v571_v10  ;;  %v573_v13 = vmul.f32 %v1847_v11, %v2404_v18  ;;  %v646_v20 = vmul.f32 %v2462_v47, %v570_v14  ;;  %v409_v35 = vpop.xlane.xlu0 %408 }
 0x11c   : > { %903 = vmatmul.mubr.f32.gmra.mrb[2].mxu0 %v642_v8  ;;  %1160 = vmatmul.mubr.f32.gmra.mrb[2].mxu1 %v642_v8  ;;  %v1849_v17 = vpop.eup %1848  ;;  %v572_v22 = vmul.f32 %v1902_v21, %v1847_v11  ;;  %1856 = vrsqrt.f32 %v509_v19  ;;  %v511_v37 = vadd.f32 1e-06, %v479_v27  ;;  %v480_v41 = vmul.f32 0.00390625, %v409_v35  ;;  %v1912_v11 = vld [vmem:[%s2352_s28 + $0x90] sm:$0xff]  ;;  %v1914_v19 = vld [vmem:[%s2352_s28 + $0xa0] sm:$0xff] }
 0x11d   : > { %908 = vmatprep.mubr.f32.mxu0 %v645_v9  ;;  %1165 = vmatprep.mubr.f32.mxu1 %v645_v9  ;;  %v649_v24 = vmul.f32 %v2464_v48, %v573_v13  ;;  %v575_v18 = vmul.f32 %v1903_v25, %v1849_v17  ;;  %v574_v31 = vmul.f32 %v1904_v30, %v1849_v17  ;;  %1858 = vrsqrt.f32 %v510_v29  ;;  %v412_v42 = vpop.xlane.xlu1 %411 }
 0x11e   : > { %v1851_v26 = vpop.eup %1850  ;;  %v648_v28 = vmul.f32 %v2462_v47, %v572_v22  ;;  %v481_v49 = vmul.f32 0.00390625, %v412_v42  ;;  %1860 = vrsqrt.f32 %v511_v37  ;;  %v512_v51 = vadd.f32 1e-06, %v480_v41  ;;  %v1918_v37 = vld [vmem:[%s2352_s28 + $0xc0] sm:$0xff]  ;;  %v1919_v42 = vld [vmem:[%s2352_s28 + $0xd8] sm:$0xff] }
 0x11f   : > { %v651_v32 = vmul.f32 %v2464_v48, %v575_v18  ;;  %v577_v34 = vmul.f32 %v1905_v33, %v1851_v26  ;;  %v650_v38 = vmul.f32 %v2462_v47, %v574_v31  ;;  %v576_v40 = vmul.f32 %v1906_v39, %v1851_v26  ;;  %v415_v57 = vpop.xlane.xlu0 %414  ;;  %v1917_v31 = vld [vmem:[%s2352_s28 + $0xc8] sm:$0xff] }
 0x120   : > { %909 = vmatmul.mubr.f32.gmra.mrb[4].mxu0 %v644_v5  ;;  %1166 = vmatmul.mubr.f32.gmra.mrb[4].mxu1 %v644_v5  ;;  %v1853_v36 = vpop.eup %1852  ;;  %v513_v59 = vadd.f32 1e-06, %v481_v49  ;;  %1862 = vrsqrt.f32 %v512_v51  ;;  %v482_v1 = vmul.f32 0.00390625, %v415_v57 }
 0x121   : > { %914 = vmatprep.mubr.f32.mxu0 %v647_v15  ;;  %1171 = vmatprep.mubr.f32.mxu1 %v647_v15  ;;  %v653_v43 = vmul.f32 %v2464_v48, %v577_v34  ;;  %v579_v45 = vmul.f32 %v1907_v44, %v1853_v36  ;;  %v652_v50 = vmul.f32 %v2462_v47, %v576_v40  ;;  %v418_v0 = vpop.xlane.xlu1 %417 }
 0x122   : > { %v1855_v46 = vpop.eup %1854  ;;  %v578_v53 = vmul.f32 %v1908_v52, %v1853_v36  ;;  %v483_v8 = vmul.f32 0.00390625, %v418_v0  ;;  %1864 = vrsqrt.f32 %v513_v59  ;;  %v514_v10 = vadd.f32 1e-06, %v482_v1  ;;  %v1922_v59 = vld [vmem:[%s2352_s28 + $0xe0] sm:$0xff]  ;;  %v1923_v0 = vld [vmem:[%s2352_s28 + $0xf8] sm:$0xff] }
 0x123   : > { %v655_v54 = vmul.f32 %v2464_v48, %v579_v45  ;;  %v581_v56 = vmul.f32 %v1909_v55, %v1855_v46  ;;  %v580_v62 = vmul.f32 %v1910_v61, %v1855_v46  ;;  %v421_v15 = vpop.xlane.xlu0 %420 }
 0x124   : > { %915 = vmatmul.mubr.f32.gmra.mrb[6].mxu0 %v646_v20  ;;  %1172 = vmatmul.mubr.f32.gmra.mrb[6].mxu1 %v646_v20  ;;  %v654_v60 = vmul.f32 %v2462_v47, %v578_v53  ;;  %v515_v16 = vadd.f32 1e-06, %v483_v8  ;;  %1866 = vrsqrt.f32 %v514_v10  ;;  %v484_v21 = vmul.f32 0.00390625, %v421_v15  ;;  %v1921_v53 = vld [vmem:[%s2352_s28 + $0xe8] sm:$0xff] }
 0x125   : > { %920 = vmatprep.mubr.f32.mxu0 %v649_v24  ;;  %1177 = vmatprep.mubr.f32.mxu1 %v649_v24  ;;  %v657_v63 = vmul.f32 %v2464_v48, %v581_v56  ;;  %v656_v9 = vmul.f32 %v2462_v47, %v580_v62  ;;  %v424_v22 = vpop.xlane.xlu1 %423 }
 0x126   : > { %v1857_v58 = vpop.eup %1856  ;;  %v485_v18 = vmul.f32 0.00390625, %v424_v22  ;;  %1868 = vrsqrt.f32 %v515_v16  ;;  %v516_v27 = vadd.f32 1e-06, %v484_v21  ;;  %v1926_v16 = vld [vmem:[%s2352_s28 + $0x100] sm:$0xff]  ;;  %v1927_v22 = vld [vmem:[%s2352_s28 + $0x118] sm:$0xff] }
 0x127   : > { %v583_v4 = vmul.f32 %v1911_v3, %v1857_v58  ;;  %v1859_v6 = vpop.eup %1858  ;;  %v582_v2 = vmul.f32 %v1912_v11, %v1857_v58  ;;  %v427_v33 = vpop.xlane.xlu0 %426 }
 0x128   : > { %921 = vmatmul.mubr.f32.gmra.mrb[8].mxu0 %v648_v28  ;;  %1178 = vmatmul.mubr.f32.gmra.mrb[8].mxu1 %v648_v28  ;;  %v585_v14 = vmul.f32 %v1913_v7, %v1859_v6  ;;  %v1861_v13 = vpop.eup %1860  ;;  %v584_v20 = vmul.f32 %v1914_v19, %v1859_v6  ;;  %v1916_v28 = vld [vmem:[%s2352_s28 + $0xb0] sm:$0xff]  ;;  %v517_v35 = vadd.f32 1e-06, %v485_v18  ;;  %1870 = vrsqrt.f32 %v516_v27 }
 0x129   : > { %926 = vmatprep.mubr.f32.mxu0 %v651_v32  ;;  %1183 = vmatprep.mubr.f32.mxu1 %v651_v32  ;;  %v659_v5 = vmul.f32 %v2464_v48, %v583_v4  ;;  %v658_v17 = vmul.f32 %v2462_v47, %v582_v2  ;;  %v587_v24 = vmul.f32 %v1915_v12, %v1861_v13  ;;  %v486_v39 = vmul.f32 0.00390625, %v427_v33  ;;  %v430_v40 = vpop.xlane.xlu1 %429  ;;  %v1925_v2 = vld [vmem:[%s2352_s28 + $0x108] sm:$0xff] }
 0x12a   : > { %v661_v23 = vmul.f32 %v2464_v48, %v585_v14  ;;  %v1863_v25 = vpop.eup %1862  ;;  %v660_v26 = vmul.f32 %v2462_v47, %v584_v20  ;;  %v586_v29 = vmul.f32 %v1916_v28, %v1861_v13  ;;  %v487_v45 = vmul.f32 0.00390625, %v430_v40  ;;  %v1931_v40 = vld [vmem:[%s2352_s28 + $0x138] sm:$0xff] }
 0x12b   : > { %v663_v30 = vmul.f32 %v2464_v48, %v587_v24  ;;  %v589_v32 = vmul.f32 %v1917_v31, %v1863_v25  ;;  %1872 = vrsqrt.f32 %v517_v35  ;;  %v518_v49 = vadd.f32 1e-06, %v486_v39  ;;  %v433_v55 = vpop.xlane.xlu0 %432  ;;  %v1930_v35 = vld [vmem:[%s2352_s28 + $0x120] sm:$0xff] }
 0x12c   : > { %927 = vmatmul.mubr.f32.gmra.mrb[10].mxu0 %v650_v38  ;;  %1184 = vmatmul.mubr.f32.gmra.mrb[10].mxu1 %v650_v38  ;;  %v1865_v34 = vpop.eup %1864  ;;  %v662_v36 = vmul.f32 %v2462_v47, %v586_v29  ;;  %v588_v38 = vmul.f32 %v1918_v37, %v1863_v25  ;;  %v519_v57 = vadd.f32 1e-06, %v487_v45  ;;  %v488_v61 = vmul.f32 0.00390625, %v433_v55  ;;  %v1929_v29 = vld [vmem:[%s2352_s28 + $0x128] sm:$0xff] }
 0x12d   : > { %932 = vmatprep.mubr.f32.mxu0 %v653_v43  ;;  %1189 = vmatprep.mubr.f32.mxu1 %v653_v43  ;;  %v665_v41 = vmul.f32 %v2464_v48, %v589_v32  ;;  %v591_v43 = vmul.f32 %v1919_v42, %v1865_v34  ;;  %1874 = vrsqrt.f32 %v518_v49  ;;  %v436_v62 = vpop.xlane.xlu1 %435 }
 0x12e   : > { %v1867_v44 = vpop.eup %1866  ;;  %v664_v46 = vmul.f32 %v2462_v47, %v588_v38  ;;  %v489_v4 = vmul.f32 0.00390625, %v436_v62  ;;  %1876 = vrsqrt.f32 %v519_v57  ;;  %v520_v8 = vadd.f32 1e-06, %v488_v61  ;;  %v1934_v57 = vld [vmem:[%s2352_s28 + $0x140] sm:$0xff]  ;;  %v1935_v62 = vld [vmem:[%s2352_s28 + $0x158] sm:$0xff] }
 0x12f   : > { %v667_v52 = vmul.f32 %v2464_v48, %v591_v43  ;;  %v439_v7 = vpop.xlane.xlu0 %438 }
 0x130   : > { %933 = vmatmul.mubr.f32.gmra.mrb[12].mxu0 %v652_v50  ;;  %1190 = vmatmul.mubr.f32.gmra.mrb[12].mxu1 %v652_v50  ;;  %v1920_v50 = vld [vmem:[%s2352_s28 + $0xd0] sm:$0xff]  ;;  %v1869_v56 = vpop.eup %1868  ;;  %v521_v15 = vadd.f32 1e-06, %v489_v4  ;;  %1878 = vrsqrt.f32 %v520_v8  ;;  %v490_v19 = vmul.f32 0.00390625, %v439_v7 }
 0x131   : > { %938 = vmatprep.mubr.f32.mxu0 %v655_v54  ;;  %1195 = vmatprep.mubr.f32.mxu1 %v655_v54  ;;  %v590_v51 = vmul.f32 %v1920_v50, %v1865_v34  ;;  %v593_v54 = vmul.f32 %v1921_v53, %v1867_v44  ;;  %v442_v20 = vpop.xlane.xlu1 %441 }
 0x132   : > { %v1871_v3 = vpop.eup %1870  ;;  %v491_v24 = vmul.f32 0.00390625, %v442_v20  ;;  %1880 = vrsqrt.f32 %v521_v15  ;;  %v522_v18 = vadd.f32 1e-06, %v490_v19  ;;  %v1938_v15 = vld [vmem:[%s2352_s28 + $0x160] sm:$0xff]  ;;  %v1939_v20 = vld [vmem:[%s2352_s28 + $0x178] sm:$0xff] }
 0x133   : > { %v666_v58 = vmul.f32 %v2462_v47, %v590_v51  ;;  %v669_v1 = vmul.f32 %v2464_v48, %v593_v54  ;;  %v445_v31 = vpop.xlane.xlu0 %444  ;;  %v1933_v51 = vld [vmem:[%s2352_s28 + $0x148] sm:$0xff] }
 0x134   : > { %939 = vmatmul.mubr.f32.gmra.mrb[14].mxu0 %v654_v60  ;;  %1196 = vmatmul.mubr.f32.gmra.mrb[14].mxu1 %v654_v60  ;;  %v592_v60 = vmul.f32 %v1922_v59, %v1867_v44  ;;  %v523_v33 = vadd.f32 1e-06, %v491_v24  ;;  %1882 = vrsqrt.f32 %v522_v18  ;;  %v492_v37 = vmul.f32 0.00390625, %v445_v31 }
 0x135   : > { %944 = vmatprep.mubr.f32.mxu0 %v657_v63  ;;  %1201 = vmatprep.mubr.f32.mxu1 %v657_v63  ;;  %v595_v63 = vmul.f32 %v1923_v0, %v1869_v56  ;;  %v1873_v14 = vpop.eup %1872  ;;  %v448_v38 = vpop.xlane.xlu1 %447 }
 0x136   : > { %v668_v6 = vmul.f32 %v2462_v47, %v592_v60  ;;  %v493_v43 = vmul.f32 0.00390625, %v448_v38  ;;  %1884 = vrsqrt.f32 %v523_v33  ;;  %v524_v45 = vadd.f32 1e-06, %v492_v37  ;;  %v1942_v33 = vld [vmem:[%s2352_s28 + $0x180] sm:$0xff]  ;;  %v1943_v37 = vld [vmem:[%s2352_s28 + $0x198] sm:$0xff] }
 0x137   : > { %v671_v11 = vmul.f32 %v2464_v48, %v595_v63  ;;  %v1875_v12 = vpop.eup %1874  ;;  %v451_v53 = vpop.xlane.xlu0 %450 }
 0x138   : > { %945 = vmatmul.mubr.f32.gmra.mrb[16].mxu0 %v656_v9  ;;  %1202 = vmatmul.mubr.f32.gmra.mrb[16].mxu1 %v656_v9  ;;  %v1924_v9 = vld [vmem:[%s2352_s28 + $0xf0] sm:$0xff]  ;;  %v1877_v32 = vpop.eup %1876  ;;  %v525_v55 = vadd.f32 1e-06, %v493_v43  ;;  %1886 = vrsqrt.f32 %v524_v45  ;;  %v494_v59 = vmul.f32 0.00390625, %v451_v53 }
 0x139   : > { %950 = vmatprep.mubr.f32.mxu0 %v659_v5  ;;  %1207 = vmatprep.mubr.f32.mxu1 %v659_v5  ;;  %v594_v10 = vmul.f32 %v1924_v9, %v1869_v56  ;;  %v597_v5 = vmul.f32 %v1925_v2, %v1871_v3  ;;  %v454_v60 = vpop.xlane.xlu1 %453  ;;  %v1944_v43 = vld [vmem:[%s2352_s28 + $0x190] sm:$0xff] }
 0x13a   : > { %v1879_v42 = vpop.eup %1878  ;;  %v495_v63 = vmul.f32 0.00390625, %v454_v60  ;;  %1888 = vrsqrt.f32 %v525_v55  ;;  %v526_v4 = vadd.f32 1e-06, %v494_v59 }
 0x13b   : > { %v670_v13 = vmul.f32 %v2462_v47, %v594_v10  ;;  %v673_v21 = vmul.f32 %v2464_v48, %v597_v5  ;;  %v1937_v10 = vld [vmem:[%s2352_s28 + $0x168] sm:$0xff]  ;;  %v457_v2 = vpop.xlane.xlu0 %456 }
 0x13c   : > { %951 = vmatmul.mubr.f32.gmra.mrb[18].mxu0 %v658_v17  ;;  %1208 = vmatmul.mubr.f32.gmra.mrb[18].mxu1 %v658_v17  ;;  %v596_v17 = vmul.f32 %v1926_v16, %v1871_v3  ;;  %v1881_v54 = vpop.eup %1880  ;;  %v527_v7 = vadd.f32 1e-06, %v495_v63  ;;  %1890 = vrsqrt.f32 %v526_v4  ;;  %v496_v16 = vmul.f32 0.00390625, %v457_v2  ;;  %v1949_v63 = vld [vmem:[%s2352_s28 + $0x1c8] sm:$0xff] }
 0x13d   : > { %956 = vmatprep.mubr.f32.mxu0 %v661_v23  ;;  %1213 = vmatprep.mubr.f32.mxu1 %v661_v23  ;;  %v599_v23 = vmul.f32 %v1927_v22, %v1873_v14 }
 0x13e   : > { %v672_v25 = vmul.f32 %v2462_v47, %v596_v17  ;;  %v1883_v0 = vpop.eup %1882  ;;  %v460_v17 = vpop.xlane.xlu1 %459  ;;  %1892 = vrsqrt.f32 %v527_v7  ;;  %v528_v24 = vadd.f32 1e-06, %v496_v16  ;;  %v1952_v7 = vld [vmem:[%s2352_s28 + $0x1d0] sm:$0xff] }
 0x13f   : > { %v675_v28 = vmul.f32 %v2464_v48, %v599_v23  ;;  %v497_v23 = vmul.f32 0.00390625, %v460_v17 }
 0x140   : > { %957 = vmatmul.mubr.f32.gmra.mrb[20].mxu0 %v660_v26  ;;  %1214 = vmatmul.mubr.f32.gmra.mrb[20].mxu1 %v660_v26  ;;  %v1928_v26 = vld [vmem:[%s2352_s28 + $0x110] sm:$0xff]  ;;  %v1885_v5 = vpop.eup %1884  ;;  %1894 = vrsqrt.f32 %v528_v24 }
 0x141   : > { %962 = vmatprep.mubr.f32.mxu0 %v663_v30  ;;  %1219 = vmatprep.mubr.f32.mxu1 %v663_v30  ;;  %v598_v27 = vmul.f32 %v1928_v26, %v1873_v14  ;;  %v601_v30 = vmul.f32 %v1929_v29, %v1875_v12  ;;  %v463_v29 = vpop.xlane.xlu0 %462  ;;  %v529_v31 = vadd.f32 1e-06, %v497_v23  ;;  %v1955_v23 = vld [vmem:[%s2352_s28 + $0x1f8] sm:$0xff] }
 0x142   : > { %v1887_v22 = vpop.eup %1886 }
 0x143   : > { %v674_v34 = vmul.f32 %v2462_v47, %v598_v27  ;;  %v677_v39 = vmul.f32 %v2464_v48, %v601_v30  ;;  %v1941_v27 = vld [vmem:[%s2352_s28 + $0x188] sm:$0xff]  ;;  %1896 = vrsqrt.f32 %v529_v31 }
 0x144   : > { %963 = vmatmul.mubr.f32.gmra.mrb[22].mxu0 %v662_v36  ;;  %1220 = vmatmul.mubr.f32.gmra.mrb[22].mxu1 %v662_v36  ;;  %v600_v36 = vmul.f32 %v1930_v35, %v1875_v12  ;;  %v1889_v30 = vpop.eup %1888  ;;  %v498_v35 = vmul.f32 0.00390625, %v463_v29 }
 0x145   : > { %968 = vmatprep.mubr.f32.mxu0 %v665_v41  ;;  %1225 = vmatprep.mubr.f32.mxu1 %v665_v41  ;;  %v603_v41 = vmul.f32 %v1931_v40, %v1877_v32  ;;  %v615_v38 = vmul.f32 %v1943_v37, %v1889_v30 }
 0x146   : > { %v676_v44 = vmul.f32 %v2462_v47, %v600_v36  ;;  %v1891_v40 = vpop.eup %1890 }
 0x147   : > { %v679_v50 = vmul.f32 %v2464_v48, %v603_v41 }
 0x148   : > { %969 = vmatmul.mubr.f32.gmra.mrb[24].mxu0 %v664_v46  ;;  %1226 = vmatmul.mubr.f32.gmra.mrb[24].mxu1 %v664_v46  ;;  %v1932_v46 = vld [vmem:[%s2352_s28 + $0x130] sm:$0xff] }
 0x149   : > { %974 = vmatprep.mubr.f32.mxu0 %v667_v52  ;;  %1231 = vmatprep.mubr.f32.mxu1 %v667_v52  ;;  %v602_v49 = vmul.f32 %v1932_v46, %v1877_v32  ;;  %v605_v52 = vmul.f32 %v1933_v51, %v1879_v42  ;;  %v691_v46 = vmul.f32 %v2464_v48, %v615_v38  ;;  %v1893_v51 = vpop.eup %1892 }
 0x14a   : > { %v1895_v59 = vpop.eup %1894 }
 0x14b   : > { %v678_v56 = vmul.f32 %v2462_v47, %v602_v49  ;;  %v681_v61 = vmul.f32 %v2464_v48, %v605_v52  ;;  %v1945_v49 = vld [vmem:[%s2352_s28 + $0x1a8] sm:$0xff] }
 0x14c   : > { %975 = vmatmul.mubr.f32.gmra.mrb[26].mxu0 %v666_v58  ;;  %1232 = vmatmul.mubr.f32.gmra.mrb[26].mxu1 %v666_v58  ;;  %v604_v58 = vmul.f32 %v1934_v57, %v1879_v42  ;;  %v530_v42 = vadd.f32 1e-06, %v498_v35  ;;  %v1947_v57 = vld [vmem:[%s2352_s28 + $0x1b8] sm:$0xff] }
 0x14d   : > { %980 = vmatprep.mubr.f32.mxu0 %v669_v1  ;;  %1237 = vmatprep.mubr.f32.mxu1 %v669_v1  ;;  %v607_v1 = vmul.f32 %v1935_v62, %v1881_v54 }
 0x14e   : > { %v680_v3 = vmul.f32 %v2462_v47, %v604_v58  ;;  %1898 = vrsqrt.f32 %v530_v42  ;;  %v619_v58 = vmul.f32 %v1947_v57, %v1893_v51 }
 0x14f   : > { %v683_v9 = vmul.f32 %v2464_v48, %v607_v1  ;;  %v1897_v1 = vpop.eup %1896 }
 0x150   : > { %981 = vmatmul.mubr.f32.gmra.mrb[28].mxu0 %v668_v6  ;;  %1238 = vmatmul.mubr.f32.gmra.mrb[28].mxu1 %v668_v6  ;;  %v1936_v6 = vld [vmem:[%s2352_s28 + $0x150] sm:$0xff] }
 0x151   : > { %986 = vmatprep.mubr.f32.mxu0 %v671_v11  ;;  %1243 = vmatprep.mubr.f32.mxu1 %v671_v11  ;;  %v606_v8 = vmul.f32 %v1936_v6, %v1881_v54  ;;  %v609_v11 = vmul.f32 %v1937_v10, %v1883_v0  ;;  %v1946_v54 = vld [vmem:[%s2352_s28 + $0x1a0] sm:$0xff]  ;;  %v1951_v10 = vld [vmem:[%s2352_s28 + $0x1d8] sm:$0xff] }
 0x152   : > { %v616_v55 = vmul.f32 %v1946_v54, %v1891_v40  ;;  %v1950_v6 = vld [vmem:[%s2352_s28 + $0x1c0] sm:$0xff] }
 0x153   : > { %v682_v14 = vmul.f32 %v2462_v47, %v606_v8  ;;  %v685_v19 = vmul.f32 %v2464_v48, %v609_v11  ;;  %v620_v8 = vmul.f32 %v1950_v6, %v1895_v59  ;;  %v623_v11 = vmul.f32 %v1951_v10, %v1897_v1 }
 0x154   : > { %987 = vmatmul.mubr.f32.gmra.mrb[30].mxu0 %v670_v13  ;;  %1244 = vmatmul.mubr.f32.gmra.mrb[30].mxu1 %v670_v13  ;;  %v608_v13 = vmul.f32 %v1938_v15, %v1883_v0  ;;  %v692_v60 = vmul.f32 %v2462_v47, %v616_v55  ;;  %v695_v0 = vmul.f32 %v2464_v48, %v619_v58 }
 0x155   : > { %992 = vmatprep.mubr.f32.mxu0 %v673_v21  ;;  %1249 = vmatprep.mubr.f32.mxu1 %v673_v21  ;;  %v611_v21 = vmul.f32 %v1939_v20, %v1885_v5  ;;  %v699_v15 = vmul.f32 %v2464_v48, %v623_v11  ;;  %v1954_v20 = vld [vmem:[%s2352_s28 + $0x1e0] sm:$0xff] }
 0x156   : > { %v684_v12 = vmul.f32 %v2462_v47, %v608_v13  ;;  %v1953_v13 = vld [vmem:[%s2352_s28 + $0x1e8] sm:$0xff] }
 0x157   : > { %v687_v26 = vmul.f32 %v2464_v48, %v611_v21 }
 0x158   : > { %993 = vmatmul.mubr.f32.gmra.mrb[32].mxu0 %v672_v25  ;;  %1250 = vmatmul.mubr.f32.gmra.mrb[32].mxu1 %v672_v25  ;;  %v1940_v25 = vld [vmem:[%s2352_s28 + $0x170] sm:$0xff]  ;;  %v1899_v2 = vpop.eup %1898 }
 0x159   : > { %998 = vmatprep.mubr.f32.mxu0 %v675_v28  ;;  %1255 = vmatprep.mubr.f32.mxu1 %v675_v28  ;;  %v610_v18 = vmul.f32 %v1940_v25, %v1885_v5  ;;  %v613_v28 = vmul.f32 %v1941_v27, %v1887_v22  ;;  %v696_v5 = vmul.f32 %v2462_v47, %v620_v8  ;;  %v1956_v25 = vld [vmem:[%s2352_s28 + $0x1f0] sm:$0xff] }
 0x15a   : > { %v625_v16 = vmul.f32 %v1953_v13, %v1899_v2  ;;  %v624_v21 = vmul.f32 %v1954_v20, %v1899_v2 }
 0x15b   : > { %v686_v32 = vmul.f32 %v2462_v47, %v610_v18  ;;  %v689_v36 = vmul.f32 %v2464_v48, %v613_v28 }
 0x15c   : > { %999 = vmatmul.mubr.f32.gmra.mrb[34].mxu0 %v674_v34  ;;  %1256 = vmatmul.mubr.f32.gmra.mrb[34].mxu1 %v674_v34  ;;  %v612_v34 = vmul.f32 %v1942_v33, %v1887_v22  ;;  %v701_v22 = vmul.f32 %v2464_v48, %v625_v16  ;;  %v700_v24 = vmul.f32 %v2462_v47, %v624_v21 }
 0x15d   : > { %1004 = vmatprep.mubr.f32.mxu0 %v677_v39  ;;  %1261 = vmatprep.mubr.f32.mxu1 %v677_v39  ;;  %v466_v39 = vpop.xlane.xlu1 %465 }
 0x15e   : > { %v688_v41 = vmul.f32 %v2462_v47, %v612_v34  ;;  %v499_v45 = vmul.f32 0.00390625, %v466_v39 }
 0x160   : > { %1005 = vmatmul.mubr.f32.gmra.mrb[36].mxu0 %v676_v44  ;;  %1262 = vmatmul.mubr.f32.gmra.mrb[36].mxu1 %v676_v44  ;;  %v614_v44 = vmul.f32 %v1944_v43, %v1889_v30  ;;  %v531_v53 = vadd.f32 1e-06, %v499_v45 }
 0x161   : > { %1010 = vmatprep.mubr.f32.mxu0 %v679_v50  ;;  %1267 = vmatprep.mubr.f32.mxu1 %v679_v50  ;;  %v617_v50 = vmul.f32 %v1945_v49, %v1891_v40 }
 0x162   : > { %v690_v52 = vmul.f32 %v2462_v47, %v614_v44  ;;  %1900 = vrsqrt.f32 %v531_v53 }
 0x164   : > { %1011 = vmatmul.mubr.f32.gmra.mrb[38].mxu0 %v678_v56  ;;  %1268 = vmatmul.mubr.f32.gmra.mrb[38].mxu1 %v678_v56  ;;  %v693_v56 = vmul.f32 %v2464_v48, %v617_v50 }
 0x165   : > { %1016 = vmatprep.mubr.f32.mxu0 %v681_v61  ;;  %1273 = vmatprep.mubr.f32.mxu1 %v681_v61  ;;  %v1948_v61 = vld [vmem:[%s2352_s28 + $0x1b0] sm:$0xff] }
 0x166   : > { %v618_v62 = vmul.f32 %v1948_v61, %v1893_v51 }
 0x168   : > { %1017 = vmatmul.mubr.f32.gmra.mrb[40].mxu0 %v680_v3  ;;  %1274 = vmatmul.mubr.f32.gmra.mrb[40].mxu1 %v680_v3  ;;  %v621_v3 = vmul.f32 %v1949_v63, %v1895_v59  ;;  %v694_v4 = vmul.f32 %v2462_v47, %v618_v62 }
 0x169   : > { %1022 = vmatprep.mubr.f32.mxu0 %v683_v9  ;;  %1279 = vmatprep.mubr.f32.mxu1 %v683_v9 }
 0x16a   : > { %v697_v9 = vmul.f32 %v2464_v48, %v621_v3 }
 0x16c   : > { %1023 = vmatmul.mubr.f32.gmra.mrb[42].mxu0 %v682_v14  ;;  %1280 = vmatmul.mubr.f32.gmra.mrb[42].mxu1 %v682_v14  ;;  %v622_v14 = vmul.f32 %v1952_v7, %v1897_v1  ;;  %v1901_v17 = vpop.eup %1900 }
 0x16d   : > { %1028 = vmatprep.mubr.f32.mxu0 %v685_v19  ;;  %1285 = vmatprep.mubr.f32.mxu1 %v685_v19  ;;  %v626_v18 = vmul.f32 %v1956_v25, %v1901_v17 }
 0x16e   : > { %v698_v19 = vmul.f32 %v2462_v47, %v622_v14 }
 0x16f   : > { %v702_v27 = vmul.f32 %v2462_v47, %v626_v18 }
 0x170   : > { %1029 = vmatmul.mubr.f32.gmra.mrb[44].mxu0 %v684_v12  ;;  %1286 = vmatmul.mubr.f32.gmra.mrb[44].mxu1 %v684_v12  ;;  %v627_v12 = vmul.f32 %v1955_v23, %v1901_v17 }
 0x171   : > { %1034 = vmatprep.mubr.f32.mxu0 %v687_v26  ;;  %1291 = vmatprep.mubr.f32.mxu1 %v687_v26 }
 0x172   : > { %v703_v26 = vmul.f32 %v2464_v48, %v627_v12 }
 0x174   : > { %1035 = vmatmul.mubr.f32.gmra.mrb[46].mxu0 %v686_v32  ;;  %1292 = vmatmul.mubr.f32.gmra.mrb[46].mxu1 %v686_v32 }
 0x175   : > { %1040 = vmatprep.mubr.f32.mxu0 %v689_v36  ;;  %1297 = vmatprep.mubr.f32.mxu1 %v689_v36 }
 0x178   : > { %1041 = vmatmul.mubr.f32.gmra.mrb[48].mxu0 %v688_v41  ;;  %1298 = vmatmul.mubr.f32.gmra.mrb[48].mxu1 %v688_v41 }
 0x179   : > { %1046 = vmatprep.mubr.f32.mxu0 %v691_v46  ;;  %1303 = vmatprep.mubr.f32.mxu1 %v691_v46 }
 0x17c   : > { %1047 = vmatmul.mubr.f32.gmra.mrb[50].mxu0 %v690_v52  ;;  %1304 = vmatmul.mubr.f32.gmra.mrb[50].mxu1 %v690_v52 }
 0x17d   : > { %1052 = vmatprep.mubr.f32.mxu0 %v693_v56  ;;  %1309 = vmatprep.mubr.f32.mxu1 %v693_v56 }
 0x180   : > { %1053 = vmatmul.mubr.f32.gmra.mrb[52].mxu0 %v692_v60  ;;  %1310 = vmatmul.mubr.f32.gmra.mrb[52].mxu1 %v692_v60 }
 0x181   : > { %1058 = vmatprep.mubr.f32.mxu0 %v695_v0  ;;  %1315 = vmatprep.mubr.f32.mxu1 %v695_v0 }
 0x184   : > { %1059 = vmatmul.mubr.f32.gmra.mrb[54].mxu0 %v694_v4  ;;  %1316 = vmatmul.mubr.f32.gmra.mrb[54].mxu1 %v694_v4 }
 0x185   : > { %1064 = vmatprep.mubr.f32.mxu0 %v697_v9  ;;  %1321 = vmatprep.mubr.f32.mxu1 %v697_v9 }
 0x188   : > { %1065 = vmatmul.mubr.f32.gmra.mrb[56].mxu0 %v696_v5  ;;  %1322 = vmatmul.mubr.f32.gmra.mrb[56].mxu1 %v696_v5 }
 0x189   : > { %1070 = vmatprep.mubr.f32.mxu0 %v699_v15  ;;  %1327 = vmatprep.mubr.f32.mxu1 %v699_v15 }
 0x18c   : > { %1071 = vmatmul.mubr.f32.gmra.mrb[58].mxu0 %v698_v19  ;;  %1328 = vmatmul.mubr.f32.gmra.mrb[58].mxu1 %v698_v19 }
 0x18d   : > { %1076 = vmatprep.mubr.f32.mxu0 %v701_v22  ;;  %1333 = vmatprep.mubr.f32.mxu1 %v701_v22 }
 0x190   : > { %1077 = vmatmul.mubr.f32.gmra.mrb[60].mxu0 %v700_v24  ;;  %1334 = vmatmul.mubr.f32.gmra.mrb[60].mxu1 %v700_v24 }
 0x191   : > { %1082 = vmatprep.mubr.f32.mxu0 %v703_v26  ;;  %1339 = vmatprep.mubr.f32.mxu1 %v703_v26 }
 0x194   : > { %1083 = vmatmul.mubr.f32.gmra.mrb[62].mxu0 %v702_v27  ;;  %1340 = vmatmul.mubr.f32.gmra.mrb[62].mxu1 %v702_v27 }
 0x1eb   : > { %v898_v28 = vpop.f32.mrb[0].mxu0  ;;  %v1155_v29 = vpop.f32.mrb[0].mxu1 }
 0x1ec   : > { %1346 = vst [vmem:[%s2595_s21] sm:$0xff] %v898_v28  ;;  %1348 = vst [vmem:[%s2595_s21 + $0x10] sm:$0xff] %v1155_v29  ;;  %v900_v47 = vpop.f32.mrb[1].mxu0  ;;  %v1157_v48 = vpop.f32.mrb[1].mxu1 }
 0x1ed   : > { %1347 = vst [vmem:[%s2595_s21 + $0x8] sm:$0xff] %v900_v47  ;;  %1349 = vst [vmem:[%s2595_s21 + $0x18] sm:$0xff] %v1157_v48 }
 0x1ef   : > { %v904_v30 = vpop.f32.mrb[2].mxu0  ;;  %v1161_v31 = vpop.f32.mrb[2].mxu1 }
 0x1f0   : > { %1350 = vst [vmem:[%s2595_s21 + $0x20] sm:$0xff] %v904_v30  ;;  %1352 = vst [vmem:[%s2595_s21 + $0x30] sm:$0xff] %v1161_v31  ;;  %v906_v32 = vpop.f32.mrb[3].mxu0  ;;  %v1163_v33 = vpop.f32.mrb[3].mxu1 }
 0x1f1   : > { %1351 = vst [vmem:[%s2595_s21 + $0x28] sm:$0xff] %v906_v32  ;;  %1353 = vst [vmem:[%s2595_s21 + $0x38] sm:$0xff] %v1163_v33 }
 0x1f3   : > { %v910_v34 = vpop.f32.mrb[4].mxu0  ;;  %v1167_v35 = vpop.f32.mrb[4].mxu1 }
 0x1f4   : > { %1354 = vst [vmem:[%s2595_s21 + $0x40] sm:$0xff] %v910_v34  ;;  %1356 = vst [vmem:[%s2595_s21 + $0x50] sm:$0xff] %v1167_v35  ;;  %v912_v36 = vpop.f32.mrb[5].mxu0  ;;  %v1169_v37 = vpop.f32.mrb[5].mxu1 }
 0x1f5   : > { %1355 = vst [vmem:[%s2595_s21 + $0x48] sm:$0xff] %v912_v36  ;;  %1357 = vst [vmem:[%s2595_s21 + $0x58] sm:$0xff] %v1169_v37 }
 0x1f7   : > { %v916_v38 = vpop.f32.mrb[6].mxu0  ;;  %v1173_v39 = vpop.f32.mrb[6].mxu1 }
 0x1f8   : > { %1358 = vst [vmem:[%s2595_s21 + $0x60] sm:$0xff] %v916_v38  ;;  %1360 = vst [vmem:[%s2595_s21 + $0x70] sm:$0xff] %v1173_v39  ;;  %v918_v40 = vpop.f32.mrb[7].mxu0  ;;  %v1175_v41 = vpop.f32.mrb[7].mxu1 }
 0x1f9   : > { %1359 = vst [vmem:[%s2595_s21 + $0x68] sm:$0xff] %v918_v40  ;;  %1361 = vst [vmem:[%s2595_s21 + $0x78] sm:$0xff] %v1175_v41 }
 0x1fb   : > { %v922_v42 = vpop.f32.mrb[8].mxu0  ;;  %v1179_v43 = vpop.f32.mrb[8].mxu1 }
 0x1fc   : > { %1362 = vst [vmem:[%s2595_s21 + $0x80] sm:$0xff] %v922_v42  ;;  %1364 = vst [vmem:[%s2595_s21 + $0x90] sm:$0xff] %v1179_v43  ;;  %v924_v44 = vpop.f32.mrb[9].mxu0  ;;  %v1181_v45 = vpop.f32.mrb[9].mxu1 }
 0x1fd   : > { %1363 = vst [vmem:[%s2595_s21 + $0x88] sm:$0xff] %v924_v44  ;;  %1365 = vst [vmem:[%s2595_s21 + $0x98] sm:$0xff] %v1181_v45 }
 0x1ff   : > { %v928_v46 = vpop.f32.mrb[10].mxu0  ;;  %v1185_v49 = vpop.f32.mrb[10].mxu1 }
 0x200   : > { %1366 = vst [vmem:[%s2595_s21 + $0xa0] sm:$0xff] %v928_v46  ;;  %1368 = vst [vmem:[%s2595_s21 + $0xb0] sm:$0xff] %v1185_v49  ;;  %v930_v50 = vpop.f32.mrb[11].mxu0  ;;  %v1187_v51 = vpop.f32.mrb[11].mxu1 }
 0x201   : > { %1367 = vst [vmem:[%s2595_s21 + $0xa8] sm:$0xff] %v930_v50  ;;  %1369 = vst [vmem:[%s2595_s21 + $0xb8] sm:$0xff] %v1187_v51 }
 0x203   : > { %v934_v52 = vpop.f32.mrb[12].mxu0  ;;  %v1191_v53 = vpop.f32.mrb[12].mxu1 }
 0x204   : > { %1370 = vst [vmem:[%s2595_s21 + $0xc0] sm:$0xff] %v934_v52  ;;  %1372 = vst [vmem:[%s2595_s21 + $0xd0] sm:$0xff] %v1191_v53  ;;  %v936_v54 = vpop.f32.mrb[13].mxu0  ;;  %v1193_v55 = vpop.f32.mrb[13].mxu1 }
 0x205   : > { %1371 = vst [vmem:[%s2595_s21 + $0xc8] sm:$0xff] %v936_v54  ;;  %1373 = vst [vmem:[%s2595_s21 + $0xd8] sm:$0xff] %v1193_v55 }
 0x207   : > { %v940_v56 = vpop.f32.mrb[14].mxu0  ;;  %v1197_v57 = vpop.f32.mrb[14].mxu1 }
 0x208   : > { %1374 = vst [vmem:[%s2595_s21 + $0xe0] sm:$0xff] %v940_v56  ;;  %1376 = vst [vmem:[%s2595_s21 + $0xf0] sm:$0xff] %v1197_v57  ;;  %v942_v58 = vpop.f32.mrb[15].mxu0  ;;  %v1199_v59 = vpop.f32.mrb[15].mxu1 }
 0x209   : > { %1375 = vst [vmem:[%s2595_s21 + $0xe8] sm:$0xff] %v942_v58  ;;  %1377 = vst [vmem:[%s2595_s21 + $0xf8] sm:$0xff] %v1199_v59 }
 0x20b   : > { %v946_v60 = vpop.f32.mrb[16].mxu0  ;;  %v1203_v61 = vpop.f32.mrb[16].mxu1 }
 0x20c   : > { %1378 = vst [vmem:[%s2595_s21 + $0x100] sm:$0xff] %v946_v60  ;;  %1380 = vst [vmem:[%s2595_s21 + $0x110] sm:$0xff] %v1203_v61  ;;  %v948_v62 = vpop.f32.mrb[17].mxu0  ;;  %v1205_v1 = vpop.f32.mrb[17].mxu1 }
 0x20d   : > { %1379 = vst [vmem:[%s2595_s21 + $0x108] sm:$0xff] %v948_v62  ;;  %1381 = vst [vmem:[%s2595_s21 + $0x118] sm:$0xff] %v1205_v1 }
 0x20f   : > { %v952_v0 = vpop.f32.mrb[18].mxu0  ;;  %v1209_v63 = vpop.f32.mrb[18].mxu1 }
 0x210   : > { %1382 = vst [vmem:[%s2595_s21 + $0x120] sm:$0xff] %v952_v0  ;;  %1384 = vst [vmem:[%s2595_s21 + $0x130] sm:$0xff] %v1209_v63  ;;  %v954_v3 = vpop.f32.mrb[19].mxu0  ;;  %v1211_v4 = vpop.f32.mrb[19].mxu1 }
 0x211   : > { %1383 = vst [vmem:[%s2595_s21 + $0x128] sm:$0xff] %v954_v3  ;;  %1385 = vst [vmem:[%s2595_s21 + $0x138] sm:$0xff] %v1211_v4 }
 0x213   : > { %v958_v6 = vpop.f32.mrb[20].mxu0  ;;  %v1215_v8 = vpop.f32.mrb[20].mxu1 }
 0x214   : > { %1386 = vst [vmem:[%s2595_s21 + $0x140] sm:$0xff] %v958_v6  ;;  %1388 = vst [vmem:[%s2595_s21 + $0x150] sm:$0xff] %v1215_v8  ;;  %v960_v9 = vpop.f32.mrb[21].mxu0  ;;  %v1217_v10 = vpop.f32.mrb[21].mxu1 }
 0x215   : > { %1387 = vst [vmem:[%s2595_s21 + $0x148] sm:$0xff] %v960_v9  ;;  %1389 = vst [vmem:[%s2595_s21 + $0x158] sm:$0xff] %v1217_v10 }
 0x217   : > { %v964_v11 = vpop.f32.mrb[22].mxu0  ;;  %v1221_v2 = vpop.f32.mrb[22].mxu1 }
 0x218   : > { %1390 = vst [vmem:[%s2595_s21 + $0x160] sm:$0xff] %v964_v11  ;;  %1392 = vst [vmem:[%s2595_s21 + $0x170] sm:$0xff] %v1221_v2  ;;  %v966_v5 = vpop.f32.mrb[23].mxu0  ;;  %v1223_v7 = vpop.f32.mrb[23].mxu1 }
 0x219   : > { %1391 = vst [vmem:[%s2595_s21 + $0x168] sm:$0xff] %v966_v5  ;;  %1393 = vst [vmem:[%s2595_s21 + $0x178] sm:$0xff] %v1223_v7 }
 0x21b   : > { %v970_v14 = vpop.f32.mrb[24].mxu0  ;;  %v1227_v15 = vpop.f32.mrb[24].mxu1 }
 0x21c   : > { %1394 = vst [vmem:[%s2595_s21 + $0x180] sm:$0xff] %v970_v14  ;;  %1396 = vst [vmem:[%s2595_s21 + $0x190] sm:$0xff] %v1227_v15  ;;  %v972_v13 = vpop.f32.mrb[25].mxu0  ;;  %v1229_v16 = vpop.f32.mrb[25].mxu1 }
 0x21d   : > { %1395 = vst [vmem:[%s2595_s21 + $0x188] sm:$0xff] %v972_v13  ;;  %1397 = vst [vmem:[%s2595_s21 + $0x198] sm:$0xff] %v1229_v16 }
 0x21f   : > { %v976_v17 = vpop.f32.mrb[26].mxu0  ;;  %v1233_v19 = vpop.f32.mrb[26].mxu1 }
 0x220   : > { %1398 = vst [vmem:[%s2595_s21 + $0x1a0] sm:$0xff] %v976_v17  ;;  %1400 = vst [vmem:[%s2595_s21 + $0x1b0] sm:$0xff] %v1233_v19  ;;  %v978_v20 = vpop.f32.mrb[27].mxu0  ;;  %v1235_v21 = vpop.f32.mrb[27].mxu1 }
 0x221   : > { %1399 = vst [vmem:[%s2595_s21 + $0x1a8] sm:$0xff] %v978_v20  ;;  %1401 = vst [vmem:[%s2595_s21 + $0x1b8] sm:$0xff] %v1235_v21 }
 0x223   : > { %v982_v22 = vpop.f32.mrb[28].mxu0  ;;  %v1239_v23 = vpop.f32.mrb[28].mxu1 }
 0x224   : > { %1402 = vst [vmem:[%s2595_s21 + $0x1c0] sm:$0xff] %v982_v22  ;;  %1404 = vst [vmem:[%s2595_s21 + $0x1d0] sm:$0xff] %v1239_v23  ;;  %v984_v12 = vpop.f32.mrb[29].mxu0  ;;  %v1241_v24 = vpop.f32.mrb[29].mxu1 }
 0x225   : > { %1403 = vst [vmem:[%s2595_s21 + $0x1c8] sm:$0xff] %v984_v12  ;;  %1405 = vst [vmem:[%s2595_s21 + $0x1d8] sm:$0xff] %v1241_v24 }
 0x227   : > { %v988_v25 = vpop.f32.mrb[30].mxu0  ;;  %v1245_v18 = vpop.f32.mrb[30].mxu1 }
 0x228   : > { %1406 = vst [vmem:[%s2595_s21 + $0x1e0] sm:$0xff] %v988_v25  ;;  %1408 = vst [vmem:[%s2595_s21 + $0x1f0] sm:$0xff] %v1245_v18  ;;  %v990_v26 = vpop.f32.mrb[31].mxu0  ;;  %v1247_v27 = vpop.f32.mrb[31].mxu1 }
 0x229   : > { %1407 = vst [vmem:[%s2595_s21 + $0x1e8] sm:$0xff] %v990_v26  ;;  %1409 = vst [vmem:[%s2595_s21 + $0x1f8] sm:$0xff] %v1247_v27 }
 0x22b   : > { %v994_v28 = vpop.f32.mrb[32].mxu0  ;;  %v1251_v29 = vpop.f32.mrb[32].mxu1 }
 0x22c   : > { %1410 = vst [vmem:[%s2595_s21 + $0x200] sm:$0xff] %v994_v28  ;;  %1412 = vst [vmem:[%s2595_s21 + $0x210] sm:$0xff] %v1251_v29  ;;  %v996_v47 = vpop.f32.mrb[33].mxu0  ;;  %v1253_v48 = vpop.f32.mrb[33].mxu1 }
 0x22d   : > { %1411 = vst [vmem:[%s2595_s21 + $0x208] sm:$0xff] %v996_v47  ;;  %1413 = vst [vmem:[%s2595_s21 + $0x218] sm:$0xff] %v1253_v48 }
 0x22f   : > { %v1000_v30 = vpop.f32.mrb[34].mxu0  ;;  %v1257_v31 = vpop.f32.mrb[34].mxu1 }
 0x230   : > { %1414 = vst [vmem:[%s2595_s21 + $0x220] sm:$0xff] %v1000_v30  ;;  %1416 = vst [vmem:[%s2595_s21 + $0x230] sm:$0xff] %v1257_v31  ;;  %v1002_v32 = vpop.f32.mrb[35].mxu0  ;;  %v1259_v33 = vpop.f32.mrb[35].mxu1 }
 0x231   : > { %1415 = vst [vmem:[%s2595_s21 + $0x228] sm:$0xff] %v1002_v32  ;;  %1417 = vst [vmem:[%s2595_s21 + $0x238] sm:$0xff] %v1259_v33 }
 0x233   : > { %v1006_v34 = vpop.f32.mrb[36].mxu0  ;;  %v1263_v35 = vpop.f32.mrb[36].mxu1 }
 0x234   : > { %1418 = vst [vmem:[%s2595_s21 + $0x240] sm:$0xff] %v1006_v34  ;;  %1420 = vst [vmem:[%s2595_s21 + $0x250] sm:$0xff] %v1263_v35  ;;  %v1008_v36 = vpop.f32.mrb[37].mxu0  ;;  %v1265_v37 = vpop.f32.mrb[37].mxu1 }
 0x235   : > { %1419 = vst [vmem:[%s2595_s21 + $0x248] sm:$0xff] %v1008_v36  ;;  %1421 = vst [vmem:[%s2595_s21 + $0x258] sm:$0xff] %v1265_v37 }
 0x237   : > { %v1012_v38 = vpop.f32.mrb[38].mxu0  ;;  %v1269_v39 = vpop.f32.mrb[38].mxu1 }
 0x238   : > { %1422 = vst [vmem:[%s2595_s21 + $0x260] sm:$0xff] %v1012_v38  ;;  %1424 = vst [vmem:[%s2595_s21 + $0x270] sm:$0xff] %v1269_v39  ;;  %v1014_v40 = vpop.f32.mrb[39].mxu0  ;;  %v1271_v41 = vpop.f32.mrb[39].mxu1 }
 0x239   : > { %1423 = vst [vmem:[%s2595_s21 + $0x268] sm:$0xff] %v1014_v40  ;;  %1425 = vst [vmem:[%s2595_s21 + $0x278] sm:$0xff] %v1271_v41 }
 0x23b   : > { %v1018_v42 = vpop.f32.mrb[40].mxu0  ;;  %v1275_v43 = vpop.f32.mrb[40].mxu1 }
 0x23c   : > { %1426 = vst [vmem:[%s2595_s21 + $0x280] sm:$0xff] %v1018_v42  ;;  %1428 = vst [vmem:[%s2595_s21 + $0x290] sm:$0xff] %v1275_v43  ;;  %v1020_v44 = vpop.f32.mrb[41].mxu0  ;;  %v1277_v45 = vpop.f32.mrb[41].mxu1 }
 0x23d   : > { %1427 = vst [vmem:[%s2595_s21 + $0x288] sm:$0xff] %v1020_v44  ;;  %1429 = vst [vmem:[%s2595_s21 + $0x298] sm:$0xff] %v1277_v45 }
 0x23f   : > { %v1024_v46 = vpop.f32.mrb[42].mxu0  ;;  %v1281_v49 = vpop.f32.mrb[42].mxu1 }
 0x240   : > { %1430 = vst [vmem:[%s2595_s21 + $0x2a0] sm:$0xff] %v1024_v46  ;;  %1432 = vst [vmem:[%s2595_s21 + $0x2b0] sm:$0xff] %v1281_v49  ;;  %v1026_v50 = vpop.f32.mrb[43].mxu0  ;;  %v1283_v51 = vpop.f32.mrb[43].mxu1 }
 0x241   : > { %1431 = vst [vmem:[%s2595_s21 + $0x2a8] sm:$0xff] %v1026_v50  ;;  %1433 = vst [vmem:[%s2595_s21 + $0x2b8] sm:$0xff] %v1283_v51 }
 0x243   : > { %v1030_v52 = vpop.f32.mrb[44].mxu0  ;;  %v1287_v53 = vpop.f32.mrb[44].mxu1 }
 0x244   : > { %1434 = vst [vmem:[%s2595_s21 + $0x2c0] sm:$0xff] %v1030_v52  ;;  %1436 = vst [vmem:[%s2595_s21 + $0x2d0] sm:$0xff] %v1287_v53  ;;  %v1032_v54 = vpop.f32.mrb[45].mxu0  ;;  %v1289_v55 = vpop.f32.mrb[45].mxu1 }
 0x245   : > { %1435 = vst [vmem:[%s2595_s21 + $0x2c8] sm:$0xff] %v1032_v54  ;;  %1437 = vst [vmem:[%s2595_s21 + $0x2d8] sm:$0xff] %v1289_v55 }
 0x247   : > { %v1036_v56 = vpop.f32.mrb[46].mxu0  ;;  %v1293_v57 = vpop.f32.mrb[46].mxu1 }
 0x248   : > { %1438 = vst [vmem:[%s2595_s21 + $0x2e0] sm:$0xff] %v1036_v56  ;;  %1440 = vst [vmem:[%s2595_s21 + $0x2f0] sm:$0xff] %v1293_v57  ;;  %v1038_v58 = vpop.f32.mrb[47].mxu0  ;;  %v1295_v59 = vpop.f32.mrb[47].mxu1 }
 0x249   : > { %1439 = vst [vmem:[%s2595_s21 + $0x2e8] sm:$0xff] %v1038_v58  ;;  %1441 = vst [vmem:[%s2595_s21 + $0x2f8] sm:$0xff] %v1295_v59 }
 0x24b   : > { %v1042_v60 = vpop.f32.mrb[48].mxu0  ;;  %v1299_v61 = vpop.f32.mrb[48].mxu1 }
 0x24c   : > { %1442 = vst [vmem:[%s2595_s21 + $0x300] sm:$0xff] %v1042_v60  ;;  %1444 = vst [vmem:[%s2595_s21 + $0x310] sm:$0xff] %v1299_v61  ;;  %v1044_v62 = vpop.f32.mrb[49].mxu0  ;;  %v1301_v1 = vpop.f32.mrb[49].mxu1 }
 0x24d   : > { %1443 = vst [vmem:[%s2595_s21 + $0x308] sm:$0xff] %v1044_v62  ;;  %1445 = vst [vmem:[%s2595_s21 + $0x318] sm:$0xff] %v1301_v1 }
 0x24f   : > { %v1048_v0 = vpop.f32.mrb[50].mxu0  ;;  %v1305_v63 = vpop.f32.mrb[50].mxu1 }
 0x250   : > { %1446 = vst [vmem:[%s2595_s21 + $0x320] sm:$0xff] %v1048_v0  ;;  %1448 = vst [vmem:[%s2595_s21 + $0x330] sm:$0xff] %v1305_v63  ;;  %v1050_v3 = vpop.f32.mrb[51].mxu0  ;;  %v1307_v4 = vpop.f32.mrb[51].mxu1 }
 0x251   : > { %1447 = vst [vmem:[%s2595_s21 + $0x328] sm:$0xff] %v1050_v3  ;;  %1449 = vst [vmem:[%s2595_s21 + $0x338] sm:$0xff] %v1307_v4 }
 0x253   : > { %v1054_v6 = vpop.f32.mrb[52].mxu0  ;;  %v1311_v8 = vpop.f32.mrb[52].mxu1 }
 0x254   : > { %1450 = vst [vmem:[%s2595_s21 + $0x340] sm:$0xff] %v1054_v6  ;;  %1452 = vst [vmem:[%s2595_s21 + $0x350] sm:$0xff] %v1311_v8  ;;  %v1056_v9 = vpop.f32.mrb[53].mxu0  ;;  %v1313_v10 = vpop.f32.mrb[53].mxu1 }
 0x255   : > { %1451 = vst [vmem:[%s2595_s21 + $0x348] sm:$0xff] %v1056_v9  ;;  %1453 = vst [vmem:[%s2595_s21 + $0x358] sm:$0xff] %v1313_v10 }
 0x257   : > { %v1060_v11 = vpop.f32.mrb[54].mxu0  ;;  %v1317_v2 = vpop.f32.mrb[54].mxu1 }
 0x258   : > { %1454 = vst [vmem:[%s2595_s21 + $0x360] sm:$0xff] %v1060_v11  ;;  %1456 = vst [vmem:[%s2595_s21 + $0x370] sm:$0xff] %v1317_v2  ;;  %v1062_v5 = vpop.f32.mrb[55].mxu0  ;;  %v1319_v7 = vpop.f32.mrb[55].mxu1 }
 0x259   : > { %1455 = vst [vmem:[%s2595_s21 + $0x368] sm:$0xff] %v1062_v5  ;;  %1457 = vst [vmem:[%s2595_s21 + $0x378] sm:$0xff] %v1319_v7 }
 0x25b   : > { %v1066_v14 = vpop.f32.mrb[56].mxu0  ;;  %v1323_v15 = vpop.f32.mrb[56].mxu1 }
 0x25c   : > { %1458 = vst [vmem:[%s2595_s21 + $0x380] sm:$0xff] %v1066_v14  ;;  %1460 = vst [vmem:[%s2595_s21 + $0x390] sm:$0xff] %v1323_v15  ;;  %v1068_v13 = vpop.f32.mrb[57].mxu0  ;;  %v1325_v16 = vpop.f32.mrb[57].mxu1 }
 0x25d   : > { %1459 = vst [vmem:[%s2595_s21 + $0x388] sm:$0xff] %v1068_v13  ;;  %1461 = vst [vmem:[%s2595_s21 + $0x398] sm:$0xff] %v1325_v16 }
 0x25f   : > { %v1072_v17 = vpop.f32.mrb[58].mxu0  ;;  %v1329_v19 = vpop.f32.mrb[58].mxu1 }
 0x260   : > { %1462 = vst [vmem:[%s2595_s21 + $0x3a0] sm:$0xff] %v1072_v17  ;;  %1464 = vst [vmem:[%s2595_s21 + $0x3b0] sm:$0xff] %v1329_v19  ;;  %v1074_v20 = vpop.f32.mrb[59].mxu0  ;;  %v1331_v21 = vpop.f32.mrb[59].mxu1 }
 0x261   : > { %1463 = vst [vmem:[%s2595_s21 + $0x3a8] sm:$0xff] %v1074_v20  ;;  %1465 = vst [vmem:[%s2595_s21 + $0x3b8] sm:$0xff] %v1331_v21 }
 0x263   : > { %v1078_v22 = vpop.f32.mrb[60].mxu0  ;;  %v1335_v23 = vpop.f32.mrb[60].mxu1 }
 0x264   : > { %1466 = vst [vmem:[%s2595_s21 + $0x3c0] sm:$0xff] %v1078_v22  ;;  %1468 = vst [vmem:[%s2595_s21 + $0x3d0] sm:$0xff] %v1335_v23  ;;  %v1080_v12 = vpop.f32.mrb[61].mxu0  ;;  %v1337_v24 = vpop.f32.mrb[61].mxu1 }
 0x265   : > { %1467 = vst [vmem:[%s2595_s21 + $0x3c8] sm:$0xff] %v1080_v12  ;;  %1469 = vst [vmem:[%s2595_s21 + $0x3d8] sm:$0xff] %v1337_v24 }
 0x267   : > { %v1084_v25 = vpop.f32.mrb[62].mxu0  ;;  %v1341_v18 = vpop.f32.mrb[62].mxu1 }
 0x268   : > { %1470 = vst [vmem:[%s2595_s21 + $0x3e0] sm:$0xff] %v1084_v25  ;;  %1472 = vst [vmem:[%s2595_s21 + $0x3f0] sm:$0xff] %v1341_v18  ;;  %v1086_v26 = vpop.f32.mrb[63].mxu0  ;;  %v1343_v27 = vpop.f32.mrb[63].mxu1 }
 0x269   : > { %1471 = vst [vmem:[%s2595_s21 + $0x3e8] sm:$0xff] %v1086_v26  ;;  %1473 = vst [vmem:[%s2595_s21 + $0x3f8] sm:$0xff] %v1343_v27 }
 0x26a   : > { %2056 = shalt.err (!%p2053_p8)
}
 0x26b   : > { %s2057_s22 = scalar_lea.hbm %s2726_s5, 16384  ;;  %s2061_s30 = scalar_lea.hbm %s2784_s3, 32768 }
 0x26c   : > { %p2058_p13 = scmp.ne.s32.totalorder %s2726_s5, %s2057_s22  ;;  %p2062_p7 = scmp.lt.u32.totalorder %s2726_s5, %s2784_s3 }
 0x26d   : > { %p2063_p12 = scmp.lt.u32.totalorder %s2061_s30, %s2057_s22  ;;  %p2065_p3 = scmp.lt.u32.totalorder %s2057_s22, %s2726_s5 }
 0x26e   : > { %p2059_p4 = pnand %p2058_p13, %p2804_p10 }
 0x26f   : > { %p2064_p2 = por %p2063_p12, %p2062_p7 }
 0x270   : > { %p2060_p5 = pneg %p2059_p4 }
 0x271   : > { %p2066_p11 = por %p2065_p3, %p2064_p2 }
 0x273   : > { %p2067_p1 = pnand %p2066_p11, %p2060_p5 }
 0x275   : > { %2070 = shalt.err (!%p2067_p1)
}
 0x276   : > { %s2139_s21 = smov 512   ;;  %s2140_s23 = smov 32  }
 0x277   : > { %1759 = dma.vmem_to_hbm [thread:$0]  (%p2804_p10), %s2728_s26, 16384, %s2726_s5, %s1475_s15, %s2139_s21, %s2139_s21, %s2140_s23  }
 0x278 PF: > { %s1506_s29 = sand.u32 1, %s2109_s12   ;;  %p2805_p0 = scmp.ne.s32.totalorder %s2795_s25, 0 }
 0x279   : > { %p2806_p6 = scmp.ge.s32.totalorder %s2129_s17, 2  ;;  %s1507_s10 = scalar_lea.sflag [#allocation4], %s1506_s29 }
 0x27b   : > { %p1773_p9 = pnand %p2806_p6, %p2805_p0 }
 0x27d   : > { %2104 = dma.done.wait (!%p1773_p9), %s1507_s10, 16384  }
 0x27e   : > { %2106 = vsyncadd (!%p1773_p9), %s1507_s10, 4294950912  ;;  %s20_s17 = sadd.s32 1, %s2129_s17   ;;  %s2807_s12 = smov %s2113_s13 }
 0x27f   : > { %p17_p8 = scmp.ge.s32.totalorder %s20_s17, 4   ;;  %s2808_s13 = smov %s2117_s14 }
 0x280   : > { %s2809_s14 = smov %s2343_s8  ;;  %s2810_s15 = smov %s2125_s16 }
 0x281   : > { %s2811_s16 = smov %s2813_s6  ;;  %19 = sbr.rel (!%p17_p8) target bundleno = 7 (0x7), region = 86 }
 0x288   :  { %1512 = vsyncpa [#allocation3], 1 }
 0x289   :  { %1514 = vsyncpa [#allocation3 + $0x1], 1 }
 0x28a   :  { %1515 = vsyncpa [#allocation6], 1 }
 0x28b   :  { %1516 = vsyncpa [#allocation4], 1 }
 0x28c   :  { %1518 = vsyncpa [#allocation4 + $0x1], 1 }

</bundles_post_ra>
